<compile_context>
chip_gen: v7x
topology: tpu7x:2x2x1
jax: 0.10.0
libtpu: 0.0.40
codegen_flags: <defaults>
</compile_context>

<pallas_src>
import functools

import jax
import jax.numpy as jnp
from jax.experimental import pallas as pl
from jax.experimental.pallas import tpu as pltpu

BN_EPS = 1e-5
OUT_PAD = 128          # lane-dense width of the head output; real values in [:, :9]
TILE_N_CAP = 1024      # ~10 MiB of VMEM at TN=1024; fits v5e/v6e/v7x


def _round_up(x, m):
    return (x + m - 1) // m * m


# ----------------------------------------------------------------------------
# Fused kernel: per (batch, N-tile) step
#   relu(conv1 x + b1) -> relu(conv2 . + b2) -> relu(conv3 . + b3) -> running max
#   and, on the last N tile of each batch element, the fc head:
#   relu(fc1 f + b4) -> relu(fc2 . + b5) -> fc3 + (bias + identity), padded to 128.
# BN scales are pre-folded into the weights, shifts arrive as the b* operands.
# ----------------------------------------------------------------------------
def _stn3d_kernel(x_ref,
                  w1_ref, b1_ref,
                  w2_ref, b2_ref,
                  w3_ref, b3_ref,
                  w4_ref, b4_ref,
                  w5_ref, b5_ref,
                  w6_ref, bi6_ref,
                  out_ref, acc_ref, *, n_ch):
    n_idx = pl.program_id(1)

    @pl.when(n_idx == 0)
    def _():
        acc_ref[...] = jnp.full(acc_ref.shape, -jnp.inf, acc_ref.dtype)

    x = x_ref[0]                                   # (TN, C) f32
    w1 = w1_ref[...]                               # (C, 64) f32, BN scale folded in

    # conv1: K == input channel count is tiny (3/4), so use VPU FMAs.
    h = x[:, 0:1] * w1[0:1, :]
    for c in range(1, n_ch):
        h = h + x[:, c:c + 1] * w1[c:c + 1, :]
    h = jnp.maximum(h + b1_ref[...], 0.0)                            # (TN, 64)

    h = jnp.dot(h.astype(jnp.bfloat16), w2_ref[...],
                preferred_element_type=jnp.float32)
    h = jnp.maximum(h + b2_ref[...], 0.0)                            # (TN, 128)

    h = jnp.dot(h.astype(jnp.bfloat16), w3_ref[...],
                preferred_element_type=jnp.float32)
    h = jnp.maximum(h + b3_ref[...], 0.0)                            # (TN, 1024)

    # Per-tile reduction: elementwise vreg maxima over TN//8 row-groups
    # (no cross-sublane XLU work in the per-tile path).
    tn, cw = h.shape
    h8 = jnp.max(h.reshape(tn // 8, 8, cw), axis=0)                  # (8, 1024)
    acc_ref[...] = jnp.maximum(acc_ref[...], h8)

    # fc head, fused: runs once per batch element on its final N tile.
    @pl.when(n_idx == pl.num_programs(1) - 1)
    def _():
        # Single 8->1 cross-sublane reduce per batch element.
        f = jnp.max(acc_ref[...], axis=0, keepdims=True)             # (1, 1024)
        g = jnp.dot(f.astype(jnp.bfloat16), w4_ref[...],
                    preferred_element_type=jnp.float32)
        g = jnp.maximum(g + b4_ref[...], 0.0)                        # (1, 512)
        g = jnp.dot(g.astype(jnp.bfloat16), w5_ref[...],
                    preferred_element_type=jnp.float32)
        g = jnp.maximum(g + b5_ref[...], 0.0)                        # (1, 256)
        out = jnp.dot(g.astype(jnp.bfloat16), w6_ref[...],
                      preferred_element_type=jnp.float32)            # (1, 128)
        out_ref[0] = out + bi6_ref[...]


# ----------------------------------------------------------------------------
# Parameter init (deterministic, PyTorch-default-style ranges) and BN folding.
# ----------------------------------------------------------------------------
def _linear_init(key, fan_in, fan_out):
    bound = 1.0 / jnp.sqrt(jnp.float32(fan_in))
    kw, kb = jax.random.split(key)
    w = jax.random.uniform(kw, (fan_in, fan_out), jnp.float32, -bound, bound)
    b = jax.random.uniform(kb, (fan_out,), jnp.float32, -bound, bound)
    return w, b


def _bn_init(key, c):
    k1, k2, k3, k4 = jax.random.split(key, 4)
    gamma = jax.random.uniform(k1, (c,), jnp.float32, 0.5, 1.5)
    beta = jax.random.uniform(k2, (c,), jnp.float32, -0.1, 0.1)
    mean = jax.random.uniform(k3, (c,), jnp.float32, -0.1, 0.1)
    var = jax.random.uniform(k4, (c,), jnp.float32, 0.5, 1.5)
    return gamma, beta, mean, var


def _fold_bn(bias, bn):
    """Fold (layer bias + BN in eval mode) into per-channel scale/shift rows."""
    gamma, beta, mean, var = bn
    scale = gamma / jnp.sqrt(var + BN_EPS)
    shift = (bias - mean) * scale + beta
    return scale[None, :], shift[None, :]          # (1, C) each


def init_stn3d_params(key, channel):
    keys = jax.random.split(key, 11)
    p = {}
    p["w1"], p["cb1"] = _linear_init(keys[0], channel, 64)
    p["w2"], p["cb2"] = _linear_init(keys[1], 64, 128)
    p["w3"], p["cb3"] = _linear_init(keys[2], 128, 1024)
    p["w4"], p["fb4"] = _linear_init(keys[3], 1024, 512)
    p["w5"], p["fb5"] = _linear_init(keys[4], 512, 256)
    p["w6"], p["fb6"] = _linear_init(keys[5], 256, 9)
    p["bn1"] = _bn_init(keys[6], 64)
    p["bn2"] = _bn_init(keys[7], 128)
    p["bn3"] = _bn_init(keys[8], 1024)
    p["bn4"] = _bn_init(keys[9], 512)
    p["bn5"] = _bn_init(keys[10], 256)
    return p


def _head_scales_shifts(params, B):
    # PyTorch STN3d skips bn4/bn5 when the pooled batch size is 1 (spec behavior).
    if B == 1:
        s4 = jnp.ones((1, 512), jnp.float32)
        b4 = params["fb4"][None, :]
        s5 = jnp.ones((1, 256), jnp.float32)
        b5 = params["fb5"][None, :]
    else:
        s4, b4 = _fold_bn(params["fb4"], params["bn4"])
        s5, b5 = _fold_bn(params["fb5"], params["bn5"])
    return s4, b4, s5, b5


# ----------------------------------------------------------------------------
# Wrapper: matches STN3d.forward — input x is (B, C, N) like PyTorch NCW.
# ----------------------------------------------------------------------------
def stn3d_forward(x, params, *, tile_n=TILE_N_CAP):
    B, C, N = x.shape

    TN = min(tile_n, _round_up(N, 8))
    N_pad = _round_up(N, TN)
    num_n = N_pad // TN

    x_bnc = jnp.transpose(x, (0, 2, 1)).astype(jnp.float32)          # (B, N, C)
    if N_pad != N:
        # Edge-pad with real points so the max pool is unchanged.
        x_bnc = jnp.pad(x_bnc, ((0, 0), (0, N_pad - N), (0, 0)), mode="edge")

    s1, b1 = _fold_bn(params["cb1"], params["bn1"])
    s2, b2 = _fold_bn(params["cb2"], params["bn2"])
    s3, b3 = _fold_bn(params["cb3"], params["bn3"])
    s4, b4, s5, b5 = _head_scales_shifts(params, B)

    # Fold BN scales into the weights (f32) before casting matmul weights to bf16.
    w1f = params["w1"] * s1                                          # stays f32 (VPU)
    w2f = (params["w2"] * s2).astype(jnp.bfloat16)
    w3f = (params["w3"] * s3).astype(jnp.bfloat16)
    w4f = (params["w4"] * s4).astype(jnp.bfloat16)
    w5f = (params["w5"] * s5).astype(jnp.bfloat16)

    iden = jnp.array([1., 0., 0., 0., 1., 0., 0., 0., 1.], jnp.float32)
    # Lane-dense head: pad fc3 weight / (bias + identity) out to 128 columns.
    w6p = jnp.zeros((256, OUT_PAD), jnp.float32).at[:, :9].set(params["w6"])
    w6p = w6p.astype(jnp.bfloat16)
    bi6 = jnp.zeros((1, OUT_PAD), jnp.float32).at[0, :9].set(params["fb6"] + iden)

    def full(shape):
        # Whole-array operand, constant block across the grid.
        return pl.BlockSpec(shape, lambda b, n: (0,) * len(shape))

    out_pad = pl.pallas_call(
        functools.partial(_stn3d_kernel, n_ch=C),
        out_shape=jax.ShapeDtypeStruct((B, 1, OUT_PAD), jnp.float32),
        grid=(B, num_n),
        in_specs=[
            pl.BlockSpec((1, TN, C), lambda b, n: (b, n, 0)),
            full((C, 64)), full((1, 64)),
            full((64, 128)), full((1, 128)),
            full((128, 1024)), full((1, 1024)),
            full((1024, 512)), full((1, 512)),
            full((512, 256)), full((1, 256)),
            full((256, OUT_PAD)), full((1, OUT_PAD)),
        ],
        out_specs=pl.BlockSpec((1, 1, OUT_PAD), lambda b, n: (b, 0, 0)),
        scratch_shapes=[pltpu.VMEM((8, 1024), jnp.float32)],
        compiler_params=pltpu.CompilerParams(
            dimension_semantics=("parallel", "arbitrary"),
            vmem_limit_bytes=48 * 1024 * 1024),
    )(x_bnc,
      w1f, b1,
      w2f, b2,
      w3f, b3,
      w4f, b4,
      w5f, b5,
      w6p, bi6)

    return out_pad[:, 0, :9].reshape(B, 3, 3)


# ----------------------------------------------------------------------------
# Pure-JAX reference with matching precision (scale folded into weights before
# the bf16 rounding; f32 accumulation).
# ----------------------------------------------------------------------------
def _bf16_matmul(a, w):
    a16 = a.astype(jnp.bfloat16).astype(jnp.float32)
    w16 = w.astype(jnp.bfloat16).astype(jnp.float32)
    return a16 @ w16


def stn3d_reference(x, params):
    B, C, N = x.shape
    h = jnp.transpose(x, (0, 2, 1)).astype(jnp.float32)
    s1, b1 = _fold_bn(params["cb1"], params["bn1"])
    h = jnp.maximum(h @ (params["w1"] * s1) + b1, 0.0)        # conv1 in f32
    for wk, bk, bnk in (("w2", "cb2", "bn2"), ("w3", "cb3", "bn3")):
        s, b = _fold_bn(params[bk], params[bnk])
        h = jnp.maximum(_bf16_matmul(h, params[wk] * s) + b, 0.0)
    f = jnp.max(h, axis=1)                                    # (B, 1024)
    s4, b4, s5, b5 = _head_scales_shifts(params, B)
    h = jnp.maximum(_bf16_matmul(f, params["w4"] * s4) + b4, 0.0)
    h = jnp.maximum(_bf16_matmul(h, params["w5"] * s5) + b5, 0.0)
    out = _bf16_matmul(h, params["w6"]) + params["fb6"]
    iden = jnp.array([1., 0., 0., 0., 1., 0., 0., 0., 1.], jnp.float32)
    return (out + iden[None, :]).reshape(B, 3, 3)


if __name__ == "__main__":
    key = jax.random.PRNGKey(0)
    kx, kp = jax.random.split(key)

    B, C, N = 2, 4, 16                       # small shapes: Conv1d(channel=4), 16 points
    x = jax.random.normal(kx, (B, C, N), jnp.float32)
    params = init_stn3d_params(kp, C)

    out = jax.block_until_ready(stn3d_forward(x, params))
    ref = jax.block_until_ready(stn3d_reference(x, params))

    assert out.shape == (B, 3, 3), out.shape
    assert jnp.allclose(out, ref, atol=2e-2, rtol=2e-2), (out, ref)
    print("KERNEL_OK")
</pallas_src>

<mosaic_0001>
module attributes {stable_mosaic.version = 11 : i64} {
  func.func @_stn3d_kernel(%arg0: i32, %arg1: i32, %arg2: memref<1x16x4xf32, #tpu.memory_space<vmem>>, %arg3: memref<4x64xf32, #tpu.memory_space<vmem>>, %arg4: memref<1x64xf32, #tpu.memory_space<vmem>>, %arg5: memref<64x128xbf16, #tpu.memory_space<vmem>>, %arg6: memref<1x128xf32, #tpu.memory_space<vmem>>, %arg7: memref<128x1024xbf16, #tpu.memory_space<vmem>>, %arg8: memref<1x1024xf32, #tpu.memory_space<vmem>>, %arg9: memref<1024x512xbf16, #tpu.memory_space<vmem>>, %arg10: memref<1x512xf32, #tpu.memory_space<vmem>>, %arg11: memref<512x256xbf16, #tpu.memory_space<vmem>>, %arg12: memref<1x256xf32, #tpu.memory_space<vmem>>, %arg13: memref<256x128xbf16, #tpu.memory_space<vmem>>, %arg14: memref<1x128xf32, #tpu.memory_space<vmem>>, %arg15: memref<1x1x128xf32, #tpu.memory_space<vmem>>, %arg16: memref<8x1024xf32, #tpu.memory_space<vmem>>) attributes {dimension_semantics = [#tpu.dimension_semantics<parallel>, #tpu.dimension_semantics<arbitrary>], iteration_bounds = array<i64: 2, 1>, scalar_prefetch = 0 : i64, scratch_operands = 1 : i64, tpu.core_type = #tpu.core_type<tc>, window_params = [{transform_indices = @transform_0, window_bounds = array<i64: 1, 16, 4>}, {pipeline_mode = #tpu.pipeline_mode<synchronous>, transform_indices = @transform_1, window_bounds = array<i64: 4, 64>}, {pipeline_mode = #tpu.pipeline_mode<synchronous>, transform_indices = @transform_2, window_bounds = array<i64: 1, 64>}, {pipeline_mode = #tpu.pipeline_mode<synchronous>, transform_indices = @transform_3, window_bounds = array<i64: 64, 128>}, {pipeline_mode = #tpu.pipeline_mode<synchronous>, transform_indices = @transform_4, window_bounds = array<i64: 1, 128>}, {pipeline_mode = #tpu.pipeline_mode<synchronous>, transform_indices = @transform_5, window_bounds = array<i64: 128, 1024>}, {pipeline_mode = #tpu.pipeline_mode<synchronous>, transform_indices = @transform_6, window_bounds = array<i64: 1, 1024>}, {pipeline_mode = #tpu.pipeline_mode<synchronous>, transform_indices = @transform_7, window_bounds = array<i64: 1024, 512>}, {pipeline_mode = #tpu.pipeline_mode<synchronous>, transform_indices = @transform_8, window_bounds = array<i64: 1, 512>}, {pipeline_mode = #tpu.pipeline_mode<synchronous>, transform_indices = @transform_9, window_bounds = array<i64: 512, 256>}, {pipeline_mode = #tpu.pipeline_mode<synchronous>, transform_indices = @transform_10, window_bounds = array<i64: 1, 256>}, {pipeline_mode = #tpu.pipeline_mode<synchronous>, transform_indices = @transform_11, window_bounds = array<i64: 256, 128>}, {pipeline_mode = #tpu.pipeline_mode<synchronous>, transform_indices = @transform_12, window_bounds = array<i64: 1, 128>}, {transform_indices = @transform_13, window_bounds = array<i64: 1, 1, 128>}]} {
    %c0_i32 = arith.constant 0 : i32
    %0 = arith.cmpi eq, %arg1, %c0_i32 : i32
    %1 = arith.extui %0 : i1 to i32
    %c0_i32_0 = arith.constant 0 : i32
    %2 = arith.cmpi ne, %1, %c0_i32_0 : i32
    scf.if %2 {
      %cst_26 = arith.constant 0xFF800000 : f32
      %58 = vector.broadcast %cst_26 : f32 to vector<8x1024xf32>
      %c0_27 = arith.constant 0 : index
      %c0_28 = arith.constant 0 : index
      %59 = vector.load %arg16[%c0_27, %c0_28] : memref<8x1024xf32, #tpu.memory_space<vmem>>, vector<8x1024xf32>
      tpu.vector_store %arg16[%c0_27, %c0_28], %58 {strides = array<i32>} : memref<8x1024xf32, #tpu.memory_space<vmem>>, vector<8x1024xf32>,
    } else {
    }
    %c0 = arith.constant 0 : index
    %c0_1 = arith.constant 0 : index
    %c0_2 = arith.constant 0 : index
    %3 = vector.load %arg2[%c0, %c0_1, %c0_2] : memref<1x16x4xf32, #tpu.memory_space<vmem>>, vector<1x16x4xf32>
    %4 = vector.shape_cast %3 : vector<1x16x4xf32> to vector<16x4xf32>
    %c0_3 = arith.constant 0 : index
    %c0_4 = arith.constant 0 : index
    %5 = vector.load %arg3[%c0_3, %c0_4] : memref<4x64xf32, #tpu.memory_space<vmem>>, vector<4x64xf32>
    %6 = vector.extract_strided_slice %4 {offsets = [0, 0], sizes = [16, 1], strides = [1, 1]} : vector<16x4xf32> to vector<16x1xf32>
    %7 = vector.extract_strided_slice %5 {offsets = [0, 0], sizes = [1, 64], strides = [1, 1]} : vector<4x64xf32> to vector<1x64xf32>
    %8 = vector.broadcast %6 : vector<16x1xf32> to vector<16x64xf32>
    %9 = vector.broadcast %7 : vector<1x64xf32> to vector<16x64xf32>
    %10 = arith.mulf %8, %9 : vector<16x64xf32>
    %11 = vector.extract_strided_slice %4 {offsets = [0, 1], sizes = [16, 1], strides = [1, 1]} : vector<16x4xf32> to vector<16x1xf32>
    %12 = vector.extract_strided_slice %5 {offsets = [1, 0], sizes = [1, 64], strides = [1, 1]} : vector<4x64xf32> to vector<1x64xf32>
    %13 = vector.broadcast %11 : vector<16x1xf32> to vector<16x64xf32>
    %14 = vector.broadcast %12 : vector<1x64xf32> to vector<16x64xf32>
    %15 = arith.mulf %13, %14 : vector<16x64xf32>
    %16 = arith.addf %10, %15 : vector<16x64xf32>
    %17 = vector.extract_strided_slice %4 {offsets = [0, 2], sizes = [16, 1], strides = [1, 1]} : vector<16x4xf32> to vector<16x1xf32>
    %18 = vector.extract_strided_slice %5 {offsets = [2, 0], sizes = [1, 64], strides = [1, 1]} : vector<4x64xf32> to vector<1x64xf32>
    %19 = vector.broadcast %17 : vector<16x1xf32> to vector<16x64xf32>
    %20 = vector.broadcast %18 : vector<1x64xf32> to vector<16x64xf32>
    %21 = arith.mulf %19, %20 : vector<16x64xf32>
    %22 = arith.addf %16, %21 : vector<16x64xf32>
    %23 = vector.extract_strided_slice %4 {offsets = [0, 3], sizes = [16, 1], strides = [1, 1]} : vector<16x4xf32> to vector<16x1xf32>
    %24 = vector.extract_strided_slice %5 {offsets = [3, 0], sizes = [1, 64], strides = [1, 1]} : vector<4x64xf32> to vector<1x64xf32>
    %25 = vector.broadcast %23 : vector<16x1xf32> to vector<16x64xf32>
    %26 = vector.broadcast %24 : vector<1x64xf32> to vector<16x64xf32>
    %27 = arith.mulf %25, %26 : vector<16x64xf32>
    %28 = arith.addf %22, %27 : vector<16x64xf32>
    %c0_5 = arith.constant 0 : index
    %c0_6 = arith.constant 0 : index
    %29 = vector.load %arg4[%c0_5, %c0_6] : memref<1x64xf32, #tpu.memory_space<vmem>>, vector<1x64xf32>
    %30 = vector.broadcast %29 : vector<1x64xf32> to vector<16x64xf32>
    %31 = arith.addf %28, %30 : vector<16x64xf32>
    %cst = arith.constant 0.000000e+00 : f32
    %32 = vector.broadcast %cst : f32 to vector<16x64xf32>
    %33 = arith.maximumf %31, %32 : vector<16x64xf32>
    %34 = arith.truncf %33 : vector<16x64xf32> to vector<16x64xbf16>
    %c0_7 = arith.constant 0 : index
    %c0_8 = arith.constant 0 : index
    %35 = vector.load %arg5[%c0_7, %c0_8] : memref<64x128xbf16, #tpu.memory_space<vmem>>, vector<64x128xbf16>
    %cst_9 = arith.constant dense<0.000000e+00> : vector<16x128xf32>
    %36 = tpu.matmul %34, %35, %cst_9 {dimension_numbers = #tpu.dot_dimension_numbers<[1], [0], [0], [1], [0, 0, 1, 1], [], []>} : vector<16x64xbf16>, vector<64x128xbf16>, vector<16x128xf32> -> vector<16x128xf32>
    %c0_10 = arith.constant 0 : index
    %c0_11 = arith.constant 0 : index
    %37 = vector.load %arg6[%c0_10, %c0_11] : memref<1x128xf32, #tpu.memory_space<vmem>>, vector<1x128xf32>
    %38 = vector.broadcast %37 : vector<1x128xf32> to vector<16x128xf32>
    %39 = arith.addf %36, %38 : vector<16x128xf32>
    %cst_12 = arith.constant 0.000000e+00 : f32
    %40 = vector.broadcast %cst_12 : f32 to vector<16x128xf32>
    %41 = arith.maximumf %39, %40 : vector<16x128xf32>
    %42 = arith.truncf %41 : vector<16x128xf32> to vector<16x128xbf16>
    %c0_13 = arith.constant 0 : index
    %c0_14 = arith.constant 0 : index
    %43 = vector.load %arg7[%c0_13, %c0_14] : memref<128x1024xbf16, #tpu.memory_space<vmem>>, vector<128x1024xbf16>
    %cst_15 = arith.constant dense<0.000000e+00> : vector<16x1024xf32>
    %44 = tpu.matmul %42, %43, %cst_15 {dimension_numbers = #tpu.dot_dimension_numbers<[1], [0], [0], [1], [0, 0, 1, 1], [], []>} : vector<16x128xbf16>, vector<128x1024xbf16>, vector<16x1024xf32> -> vector<16x1024xf32>
    %c0_16 = arith.constant 0 : index
    %c0_17 = arith.constant 0 : index
    %45 = vector.load %arg8[%c0_16, %c0_17] : memref<1x1024xf32, #tpu.memory_space<vmem>>, vector<1x1024xf32>
    %46 = vector.broadcast %45 : vector<1x1024xf32> to vector<16x1024xf32>
    %47 = arith.addf %44, %46 : vector<16x1024xf32>
    %cst_18 = arith.constant 0.000000e+00 : f32
    %48 = vector.broadcast %cst_18 : f32 to vector<16x1024xf32>
    %49 = arith.maximumf %47, %48 : vector<16x1024xf32>
    %50 = vector.shape_cast %49 : vector<16x1024xf32> to vector<2x8x1024xf32>
    %cst_19 = arith.constant dense<0xFF800000> : vector<8x1024xf32>
    %51 = vector.multi_reduction <maximumf>, %50, %cst_19 [0] : vector<2x8x1024xf32> to vector<8x1024xf32>
    %c0_20 = arith.constant 0 : index
    %c0_21 = arith.constant 0 : index
    %52 = vector.load %arg16[%c0_20, %c0_21] : memref<8x1024xf32, #tpu.memory_space<vmem>>, vector<8x1024xf32>
    %53 = arith.maximumf %52, %51 : vector<8x1024xf32>
    %c0_22 = arith.constant 0 : index
    %c0_23 = arith.constant 0 : index
    %54 = vector.load %arg16[%c0_22, %c0_23] : memref<8x1024xf32, #tpu.memory_space<vmem>>, vector<8x1024xf32>
    tpu.vector_store %arg16[%c0_22, %c0_23], %53 {strides = array<i32>} : memref<8x1024xf32, #tpu.memory_space<vmem>>, vector<8x1024xf32>,
    %c0_i32_24 = arith.constant 0 : i32
    %55 = arith.cmpi eq, %arg1, %c0_i32_24 : i32
    %56 = arith.extui %55 : i1 to i32
    %c0_i32_25 = arith.constant 0 : i32
    %57 = arith.cmpi ne, %56, %c0_i32_25 : i32
    scf.if %57 {
      %c0_26 = arith.constant 0 : index
      %c0_27 = arith.constant 0 : index
      %58 = vector.load %arg16[%c0_26, %c0_27] : memref<8x1024xf32, #tpu.memory_space<vmem>>, vector<8x1024xf32>
      %cst_28 = arith.constant dense<0xFF800000> : vector<1024xf32>
      %59 = vector.multi_reduction <maximumf>, %58, %cst_28 [0] : vector<8x1024xf32> to vector<1024xf32>
      %60 = vector.shape_cast %59 : vector<1024xf32> to vector<1x1024xf32>
      %61 = arith.truncf %60 : vector<1x1024xf32> to vector<1x1024xbf16>
      %c0_29 = arith.constant 0 : index
      %c0_30 = arith.constant 0 : index
      %62 = vector.load %arg9[%c0_29, %c0_30] : memref<1024x512xbf16, #tpu.memory_space<vmem>>, vector<1024x512xbf16>
      %cst_31 = arith.constant dense<0.000000e+00> : vector<1x512xf32>
      %63 = tpu.matmul %61, %62, %cst_31 {dimension_numbers = #tpu.dot_dimension_numbers<[1], [0], [0], [1], [0, 0, 1, 1], [], []>} : vector<1x1024xbf16>, vector<1024x512xbf16>, vector<1x512xf32> -> vector<1x512xf32>
      %c0_32 = arith.constant 0 : index
      %c0_33 = arith.constant 0 : index
      %64 = vector.load %arg10[%c0_32, %c0_33] : memref<1x512xf32, #tpu.memory_space<vmem>>, vector<1x512xf32>
      %65 = arith.addf %63, %64 : vector<1x512xf32>
      %cst_34 = arith.constant 0.000000e+00 : f32
      %66 = vector.broadcast %cst_34 : f32 to vector<1x512xf32>
      %67 = arith.maximumf %65, %66 : vector<1x512xf32>
      %68 = arith.truncf %67 : vector<1x512xf32> to vector<1x512xbf16>
      %c0_35 = arith.constant 0 : index
      %c0_36 = arith.constant 0 : index
      %69 = vector.load %arg11[%c0_35, %c0_36] : memref<512x256xbf16, #tpu.memory_space<vmem>>, vector<512x256xbf16>
      %cst_37 = arith.constant dense<0.000000e+00> : vector<1x256xf32>
      %70 = tpu.matmul %68, %69, %cst_37 {dimension_numbers = #tpu.dot_dimension_numbers<[1], [0], [0], [1], [0, 0, 1, 1], [], []>} : vector<1x512xbf16>, vector<512x256xbf16>, vector<1x256xf32> -> vector<1x256xf32>
      %c0_38 = arith.constant 0 : index
      %c0_39 = arith.constant 0 : index
      %71 = vector.load %arg12[%c0_38, %c0_39] : memref<1x256xf32, #tpu.memory_space<vmem>>, vector<1x256xf32>
      %72 = arith.addf %70, %71 : vector<1x256xf32>
      %cst_40 = arith.constant 0.000000e+00 : f32
      %73 = vector.broadcast %cst_40 : f32 to vector<1x256xf32>
      %74 = arith.maximumf %72, %73 : vector<1x256xf32>
      %75 = arith.truncf %74 : vector<1x256xf32> to vector<1x256xbf16>
      %c0_41 = arith.constant 0 : index
      %c0_42 = arith.constant 0 : index
      %76 = vector.load %arg13[%c0_41, %c0_42] : memref<256x128xbf16, #tpu.memory_space<vmem>>, vector<256x128xbf16>
      %cst_43 = arith.constant dense<0.000000e+00> : vector<1x128xf32>
      %77 = tpu.matmul %75, %76, %cst_43 {dimension_numbers = #tpu.dot_dimension_numbers<[1], [0], [0], [1], [0, 0, 1, 1], [], []>} : vector<1x256xbf16>, vector<256x128xbf16>, vector<1x128xf32> -> vector<1x128xf32>
      %c0_44 = arith.constant 0 : index
      %c0_45 = arith.constant 0 : index
      %78 = vector.load %arg14[%c0_44, %c0_45] : memref<1x128xf32, #tpu.memory_space<vmem>>, vector<1x128xf32>
      %79 = arith.addf %77, %78 : vector<1x128xf32>
      %c0_46 = arith.constant 0 : index
      %c0_47 = arith.constant 0 : index
      %c0_48 = arith.constant 0 : index
      %80 = vector.load %arg15[%c0_46, %c0_47, %c0_48] : memref<1x1x128xf32, #tpu.memory_space<vmem>>, vector<1x1x128xf32>
      %81 = vector.shape_cast %80 : vector<1x1x128xf32> to vector<1x128xf32>
      %82 = vector.shape_cast %79 : vector<1x128xf32> to vector<1x1x128xf32>
      tpu.vector_store %arg15[%c0_46, %c0_47, %c0_48], %82 {strides = array<i32>} : memref<1x1x128xf32, #tpu.memory_space<vmem>>, vector<1x1x128xf32>,
    } else {
    }
    return
  }
  func.func @transform_0(%arg0: i32, %arg1: i32) -> (i32, i32, i32) {
    %c0_i32 = arith.constant 0 : i32
    %c0_i32_0 = arith.constant 0 : i32
    return %arg0, %arg1, %c0_i32 : i32, i32, i32
  }
  func.func @transform_1(%arg0: i32, %arg1: i32) -> (i32, i32) {
    %c0_i32 = arith.constant 0 : i32
    %c0_i32_0 = arith.constant 0 : i32
    %c0_i32_1 = arith.constant 0 : i32
    return %c0_i32, %c0_i32_0 : i32, i32
  }
  func.func @transform_2(%arg0: i32, %arg1: i32) -> (i32, i32) {
    %c0_i32 = arith.constant 0 : i32
    %c0_i32_0 = arith.constant 0 : i32
    %c0_i32_1 = arith.constant 0 : i32
    return %c0_i32, %c0_i32_0 : i32, i32
  }
  func.func @transform_3(%arg0: i32, %arg1: i32) -> (i32, i32) {
    %c0_i32 = arith.constant 0 : i32
    %c0_i32_0 = arith.constant 0 : i32
    %c0_i32_1 = arith.constant 0 : i32
    return %c0_i32, %c0_i32_0 : i32, i32
  }
  func.func @transform_4(%arg0: i32, %arg1: i32) -> (i32, i32) {
    %c0_i32 = arith.constant 0 : i32
    %c0_i32_0 = arith.constant 0 : i32
    %c0_i32_1 = arith.constant 0 : i32
    return %c0_i32, %c0_i32_0 : i32, i32
  }
  func.func @transform_5(%arg0: i32, %arg1: i32) -> (i32, i32) {
    %c0_i32 = arith.constant 0 : i32
    %c0_i32_0 = arith.constant 0 : i32
    %c0_i32_1 = arith.constant 0 : i32
    return %c0_i32, %c0_i32_0 : i32, i32
  }
  func.func @transform_6(%arg0: i32, %arg1: i32) -> (i32, i32) {
    %c0_i32 = arith.constant 0 : i32
    %c0_i32_0 = arith.constant 0 : i32
    %c0_i32_1 = arith.constant 0 : i32
    return %c0_i32, %c0_i32_0 : i32, i32
  }
  func.func @transform_7(%arg0: i32, %arg1: i32) -> (i32, i32) {
    %c0_i32 = arith.constant 0 : i32
    %c0_i32_0 = arith.constant 0 : i32
    %c0_i32_1 = arith.constant 0 : i32
    return %c0_i32, %c0_i32_0 : i32, i32
  }
  func.func @transform_8(%arg0: i32, %arg1: i32) -> (i32, i32) {
    %c0_i32 = arith.constant 0 : i32
    %c0_i32_0 = arith.constant 0 : i32
    %c0_i32_1 = arith.constant 0 : i32
    return %c0_i32, %c0_i32_0 : i32, i32
  }
  func.func @transform_9(%arg0: i32, %arg1: i32) -> (i32, i32) {
    %c0_i32 = arith.constant 0 : i32
    %c0_i32_0 = arith.constant 0 : i32
    %c0_i32_1 = arith.constant 0 : i32
    return %c0_i32, %c0_i32_0 : i32, i32
  }
  func.func @transform_10(%arg0: i32, %arg1: i32) -> (i32, i32) {
    %c0_i32 = arith.constant 0 : i32
    %c0_i32_0 = arith.constant 0 : i32
    %c0_i32_1 = arith.constant 0 : i32
    return %c0_i32, %c0_i32_0 : i32, i32
  }
  func.func @transform_11(%arg0: i32, %arg1: i32) -> (i32, i32) {
    %c0_i32 = arith.constant 0 : i32
    %c0_i32_0 = arith.constant 0 : i32
    %c0_i32_1 = arith.constant 0 : i32
    return %c0_i32, %c0_i32_0 : i32, i32
  }
  func.func @transform_12(%arg0: i32, %arg1: i32) -> (i32, i32) {
    %c0_i32 = arith.constant 0 : i32
    %c0_i32_0 = arith.constant 0 : i32
    %c0_i32_1 = arith.constant 0 : i32
    return %c0_i32, %c0_i32_0 : i32, i32
  }
  func.func @transform_13(%arg0: i32, %arg1: i32) -> (i32, i32, i32) {
    %c0_i32 = arith.constant 0 : i32
    %c0_i32_0 = arith.constant 0 : i32
    %c0_i32_1 = arith.constant 0 : i32
    return %arg0, %c0_i32, %c0_i32_0 : i32, i32, i32
  }
}

</mosaic_0001>

<bundles_post_ra>
// kernel: tpu_custom_call.1
= control target key start
LH: loop header
LB: loop body
LE: loop exit
PB: predicated region body
PF: predicated region fallthrough
CT: control target
= control target key end

     0   :  { %s5840_s0 = inlined_call_operand.vmem [shape: f32[2,16,4], index: 0, kind: input, shape index: {}]   ;;  %s5841_s1 = inlined_call_operand.vmem [shape: f32[4,64], index: 1, kind: input, shape index: {}]   ;;  %s5842_s2 = inlined_call_operand.vmem [shape: f32[1,64], index: 2, kind: input, shape index: {}]   ;;  %s5843_s3 = inlined_call_operand.vmem [shape: bf16[64,128], index: 3, kind: input, shape index: {}]   ;;  %s5844_s4 = inlined_call_operand.vmem [shape: f32[1,128], index: 4, kind: input, shape index: {}]   ;;  %s5845_s5 = inlined_call_operand.hbm [shape: bf16[128,1024], index: 5, kind: input, shape index: {}]   ;;  %s5846_s6 = inlined_call_operand.vmem [shape: f32[1,1024], index: 6, kind: input, shape index: {}]   ;;  %s5847_s7 = inlined_call_operand.hbm [shape: bf16[1024,512], index: 7, kind: input, shape index: {}]   ;;  %s5848_s8 = inlined_call_operand.vmem [shape: f32[1,512], index: 8, kind: input, shape index: {}]   ;;  %s5849_s9 = inlined_call_operand.hbm [shape: bf16[512,256], index: 9, kind: input, shape index: {}]   ;;  %s5850_s10 = inlined_call_operand.vmem [shape: f32[1,256], index: 10, kind: input, shape index: {}]   ;;  %s5851_s11 = inlined_call_operand.hbm [shape: bf16[256,128], index: 11, kind: input, shape index: {}]   ;;  %s5852_s12 = inlined_call_operand.vmem [shape: f32[1,128], index: 12, kind: input, shape index: {}]   ;;  %s5853_s13 = inlined_call_operand.hbm [shape: f32[2,1,128], index: 13, kind: output, shape index: {}]  }
   0x1   :  { %5868 = sst [smem:[#allocation24_spill]] %s5847_s7 }
   0x2   :  { %5869 = sst [smem:[#allocation25_spill]] %s5852_s12 }
   0x3   :  { %5870 = sst [smem:[#allocation26_spill]] %s5853_s13 }
   0x4   :  { %18 = vsyncpa [#allocation4], 0 }
   0x5   :  { %19 = vsyncpa [#allocation7], 0 }
   0x6   :  { %20 = vsyncpa [#allocation10], 0 }
   0x7   :  { %21 = vsyncpa [#allocation5], 0 }
   0x8   :  { %23 = vsyncpa [#allocation5 + $0x1], 0  ;;  %s5494_s25 = smov 0   ;;  %s5496_s26 = smov 0  }
   0x9   :  { %s5498_s27 = smov 0   ;;  %s5500_s28 = smov 0  }
   0xa   :  { %s5502_s29 = smov 0   ;;  %s5504_s30 = smov 0  }
   0xb LB: > { %5871 = sst [smem:[#allocation16_spill]] %s5383_s25  ;;  %s4086_s14 = sadd.s32 4294967295, %s5403_s30   ;;  %s5403_s30 = sphi %s5504_s30, %s29_s30   ;;  %s5399_s29 = sphi %s5502_s29, %s5899_s29   ;;  %s5395_s28 = sphi %s5500_s28, %s5902_s28   ;;  %s5391_s27 = sphi %s5498_s27, %s5897_s27   ;;  %s5387_s26 = sphi %s5496_s26, %s5901_s26   ;;  %s5383_s25 = sphi %s5494_s25, %s5900_s25  }
   0xc   : > { %5872 = sst [smem:[#allocation17_spill]] %s5391_s27  ;;  %s4087_s15 = sadd.s32 4294967294, %s5403_s30  }
   0xd   : > { %5873 = sst [smem:[#allocation18_spill]] %s5399_s29  ;;  %s41_s16 = sadd.s32 1, %s5399_s29 }
   0xe   : > { %5874 = sst [smem:[#allocation19_spill]] %s5403_s30  ;;  %s328_s17 = sadd.s32 1, %s5391_s27 }
   0xf   : > { %p43_p0 = scmp.ge.s32.totalorder %s41_s16, 2  ;;  %p338_p1 = scmp.ne.s32.totalorder %s5391_s27, %s5387_s26 }
  0x10   : > { %p339_p2 = scmp.eq.s32.totalorder %s4086_s14, 1  ;;  %p344_p3 = scmp.ne.s32.totalorder %s5387_s26, %s5383_s25 }
  0x11   : > { %s5904_s16 = smov (%p43_p0, %s41_s16), 0  ;;  %p345_p5 = scmp.eq.s32.totalorder %s4087_s15, 1 }
  0x12   : > { %5875 = sst [smem:[#allocation20_spill]] %s5904_s16  ;;  %p5534_p4 = por %p339_p2, %p338_p1 }
  0x13   : > { %s325_s19 = ssub.s32 %s5399_s29, %s5904_s16  ;;  %p4088_p6 = scmp.ge.s32.totalorder %s5403_s30, 1 }
  0x14   : > { %s5876_s18 = scalar_select %p5534_p4, 1, 0 }
  0x15   : > { %p326_p7 = scmp.eq.s32.totalorder %s325_s19, 0  ;;  %p5541_p8 = por %p345_p5, %p344_p3 }
  0x16   : > { %5877 = sst [smem:[#allocation21_spill]] %s5876_s18  ;;  %p352_p9 = scmp.lt.s32.totalorder %s5403_s30, 3 }
  0x17   : > { %s5878_s20 = scalar_select %p5541_p8, 1, 0 }
  0x18   : > { %s5547_s21 = scalar_select %p326_p7, %s5391_s27, %s328_s17  }
  0x19   : > { %5879 = sst [smem:[#allocation22_spill]] %s5878_s20  ;;  %p5549_p10 = pnand %p4088_p6, %p352_p9 }
  0x1a   : > { %5880 = sst [smem:[#allocation23_spill]] %s5547_s21  ;;  %p5553_p11 = scmp.eq.s32.totalorder %s4086_s14, 0 }
  0x1b   : > { %s5881_s22 = scalar_select %p5549_p10, 1, 0 }
  0x1c   : > { %s5882_s23 = scalar_select %p5553_p11, 1, 0 }
  0x1d   : > { %p4603_p12 = pneg %p5549_p10  ;;  %s5405_s24 = smov [#allocation6]  }
  0x1e   : > { %s392_s15 = sshll.u32 %s5405_s24, 4  ;;  %s5406_s17 = smov [#allocation3]   ;;  %s393_s15 = int_to_ptr.vmem [resolvable:$true] %s392_s15 }
  0x1f   : > { %p5561_p13 = pnand %p5553_p11, %p4603_p12  ;;  %s376_s16 = sshll.u32 %s5406_s17, 4  ;;  %s377_s16 = int_to_ptr.vmem [resolvable:$true] %s376_s16 }
  0x20   : > { %s5884_s7 = sld [smem:[#allocation24_spill]] }
  0x21   : > { %p5573_p1 = pneg %p5561_p13 }
  0x26   : > { %s5201_s14 = scalar_lea.hbm %s5884_s7, 32768 }
  0x27   : > { %p5202_p0 = scmp.ne.s32.totalorder %s5884_s7, %s5201_s14  ;;  %p5208_p5 = scmp.lt.u32.totalorder %s5201_s14, %s5884_s7 }
  0x29   : > { %p5204_p2 = pnand %p5573_p1, %p5202_p0 }
  0x2b   : > { %p5205_p3 = pneg %p5204_p2 }
  0x2d   : > { %p5210_p6 = pnand %p5208_p5, %p5205_p3 }
  0x2f   : > { %5213 = shalt.err (!%p5210_p6)
}
  0x30   : > { %s5214_s29 = scalar_lea.vmem %s393_s15, 32768  ;;  %p5222_p8 = scmp.lt.s32.totalorder %s393_s15, %s393_s15 }
  0x31   : > { %p5215_p7 = scmp.ne.s32.totalorder %s393_s15, %s5214_s29  ;;  %p5223_p4 = scmp.lt.s32.totalorder %s5214_s29, %s5214_s29 }
  0x33   : > { %p5217_p9 = pnand %p5215_p7, %p5573_p1  ;;  %p5224_p11 = por %p5223_p4, %p5222_p8 }
  0x35   : > { %p5218_p12 = pneg %p5217_p9 }
  0x37   : > { %p5225_p10 = pnand %p5224_p11, %p5218_p12 }
  0x39   : > { %5228 = shalt.err (!%p5225_p10)
}
  0x3a   : > { %s5407_s27 = smov 256   ;;  %s5408_s20 = smov 16  }
  0x3b   : > { %4609 = dma.hbm_to_vmem [thread:$0]  (!%p5561_p13), %s5884_s7, 32768, %s393_s15, [#allocation7], %s5407_s27, %s5407_s27, %s5408_s20  }
  0x3c   : > { %s5229_s14 = scalar_lea.hbm %s5845_s5, 8192 }
  0x3d   : > { %p5230_p4 = scmp.ne.s32.totalorder %s5845_s5, %s5229_s14  ;;  %p5236_p11 = scmp.lt.u32.totalorder %s5229_s14, %s5845_s5 }
  0x3f   : > { %p5232_p8 = pnand %p5230_p4, %p5573_p1 }
  0x41   : > { %p5233_p10 = pneg %p5232_p8 }
  0x43   : > { %p5238_p0 = pnand %p5236_p11, %p5233_p10 }
  0x45   : > { %5241 = shalt.err (!%p5238_p0)
}
  0x46   : > { %s5242_s25 = scalar_lea.vmem %s377_s16, 8192  ;;  %p5250_p6 = scmp.lt.s32.totalorder %s377_s16, %s377_s16 }
  0x47   : > { %p5243_p2 = scmp.ne.s32.totalorder %s377_s16, %s5242_s25  ;;  %p5251_p7 = scmp.lt.s32.totalorder %s5242_s25, %s5242_s25 }
  0x49   : > { %p5245_p3 = pnand %p5243_p2, %p5573_p1  ;;  %p5252_p9 = por %p5251_p7, %p5250_p6 }
  0x4b   : > { %p5246_p5 = pneg %p5245_p3 }
  0x4d   : > { %p5253_p12 = pnand %p5252_p9, %p5246_p5 }
  0x4f   : > { %5256 = shalt.err (!%p5253_p12)
}
  0x50   : > { %s5409_s13 = smov 512   ;;  %s5410_s18 = smov 32  }
  0x51   : > { %4606 = dma.hbm_to_vmem [thread:$0]  (!%p5561_p13), %s5845_s5, 8192, %s377_s16, [#allocation4], %s5409_s13, %s5409_s13, %s5410_s18  }
  0x52   : > { %s5411_s27 = smov [#allocation8]   ;;  %s5257_s17 = scalar_lea.hbm %s5849_s9, 8192 }
  0x53   : > { %s408_s20 = sshll.u32 %s5411_s27, 4  ;;  %p5258_p4 = scmp.ne.s32.totalorder %s5849_s9, %s5257_s17  ;;  %s409_s20 = int_to_ptr.vmem [resolvable:$true] %s408_s20 }
  0x54   : > { %p5264_p11 = scmp.lt.u32.totalorder %s5257_s17, %s5849_s9 }
  0x55   : > { %p5260_p8 = pnand %p5258_p4, %p5573_p1 }
  0x57   : > { %p5261_p10 = pneg %p5260_p8 }
  0x59   : > { %p5266_p0 = pnand %p5264_p11, %p5261_p10 }
  0x5b   : > { %5269 = shalt.err (!%p5266_p0)
}
  0x5c   : > { %s5270_s16 = scalar_lea.vmem %s409_s20, 8192  ;;  %p5278_p6 = scmp.lt.s32.totalorder %s409_s20, %s409_s20 }
  0x5d   : > { %p5271_p2 = scmp.ne.s32.totalorder %s409_s20, %s5270_s16  ;;  %p5279_p7 = scmp.lt.s32.totalorder %s5270_s16, %s5270_s16 }
  0x5f   : > { %p5273_p3 = pnand %p5271_p2, %p5573_p1  ;;  %p5280_p9 = por %p5279_p7, %p5278_p6 }
  0x61   : > { %p5274_p5 = pneg %p5273_p3 }
  0x63   : > { %p5281_p12 = pnand %p5280_p9, %p5274_p5 }
  0x65   : > { %5284 = shalt.err (!%p5281_p12)
}
  0x66   : > { %s5412_s13 = smov 128   ;;  %s5413_s18 = smov 8  }
  0x67   : > { %4612 = dma.hbm_to_vmem [thread:$0]  (!%p5561_p13), %s5849_s9, 8192, %s409_s20, [#allocation7], %s5412_s13, %s5412_s13, %s5413_s18  }
  0x68   : > { %s5414_s15 = smov [#allocation9]   ;;  %s5285_s17 = scalar_lea.hbm %s5851_s11, 2048 }
  0x69   : > { %s424_s27 = sshll.u32 %s5414_s15, 4  ;;  %p5286_p4 = scmp.ne.s32.totalorder %s5851_s11, %s5285_s17  ;;  %s425_s27 = int_to_ptr.vmem [resolvable:$true] %s424_s27 }
  0x6a   : > { %p5292_p11 = scmp.lt.u32.totalorder %s5285_s17, %s5851_s11 }
  0x6b   : > { %p5288_p8 = pnand %p5286_p4, %p5573_p1 }
  0x6d   : > { %p5289_p10 = pneg %p5288_p8 }
  0x6f   : > { %p5294_p0 = pnand %p5292_p11, %p5289_p10 }
  0x71   : > { %5297 = shalt.err (!%p5294_p0)
}
  0x72   : > { %s5298_s20 = scalar_lea.vmem %s425_s27, 2048  ;;  %p5306_p6 = scmp.lt.s32.totalorder %s425_s27, %s425_s27 }
  0x73   : > { %p5299_p2 = scmp.ne.s32.totalorder %s425_s27, %s5298_s20  ;;  %p5307_p7 = scmp.lt.s32.totalorder %s5298_s20, %s5298_s20 }
  0x75   : > { %p5301_p3 = pnand %p5299_p2, %p5573_p1  ;;  %p5308_p9 = por %p5307_p7, %p5306_p6 }
  0x77   : > { %p5302_p5 = pneg %p5301_p3 }
  0x79   : > { %p5309_p12 = pnand %p5308_p9, %p5302_p5 }
  0x7b   : > { %5312 = shalt.err (!%p5309_p12)
}
  0x7c   : > { %s5415_s13 = smov 64   ;;  %s5416_s18 = smov 4  }
  0x7d   : > { %4615 = dma.hbm_to_vmem [thread:$0]  (!%p5561_p13), %s5851_s11, 2048, %s425_s27, [#allocation10], %s5415_s13, %s5415_s13, %s5416_s18  }
  0x7e   : > { %p5886_p4 = scmp.ne.s32.totalorder %s5881_s22, 0 }
  0x7f   : > { %p5887_p8 = scmp.ne.s32.totalorder (!%p5886_p4), %s5882_s23, 0 }
  0x80   : > { %456 = sbr.rel (%p5886_p4) target bundleno = 1682 (0x692), region = 72 }
  0x87   : > { %5366 = dma.done.wait (%p5887_p8), [#allocation4], 8192  }
  0x88   : > { %5368 = vsyncadd (%p5887_p8), [#allocation4], 4294959104 }
  0x89   : > { %5370 = dma.done.wait (%p5887_p8), [#allocation7], 40960  }
  0x8a   : > { %5372 = vsyncadd (%p5887_p8), [#allocation7], 4294926336 }
  0x8b   : > { %5374 = dma.done.wait (%p5887_p8), [#allocation10], 2048  }
  0x8c   : > { %5376 = vsyncadd (%p5887_p8), [#allocation10], 4294965248  ;;  %p516_p13 = scmp.lt.s32.totalorder %s5395_s28, 1  ;;  %v5417_v0 = vmov 1   ;;  %v5418_v1 = vmov 0   ;;  %v5419_v4 = vmov 0.0   ;;  %v551_v39 = vlaneseq }
  0x8d   : > { %4696 = vset.pattern.permute.xlu1 %v5417_v0  ;;  %4695 = vset.pattern.permute.xlu0 %v5418_v1  ;;  %v4701_v5 = vld [vmem:[%s5843_s3] sm:$0xff]   ;;  %v5420_v6 = vmov 2   ;;  %v4702_v7 = vld [vmem:[%s5843_s3 + $0x8] sm:$0xff]   ;;  %v5421_v8 = vmov 3   ;;  %v4703_v9 = vld [vmem:[%s5843_s3 + $0x10] sm:$0xff]   ;;  %vm5422_vm0 = vmmov 0  }
  0x8e   : > { %s517_s22 = scalar_select %p516_p13, %s5395_s28, 1  ;;  %1248 = vmatprep.mubr.bf16.mxu1 %v5418_v1  ;;  %4539 = vmatprep.subr.bf16.mxu0 %v5419_v4  ;;  %v4704_v10 = vld [vmem:[%s5843_s3 + $0x18] sm:$0xff]   ;;  %v5676_v11 = vld [vmem:[#allocation3] sm:$0xff]  ;;  %v706_v15 = vld [vmem:[#allocation3 + $0x10] sm:$0xff]  ;;  %v5684_v40 = vshrl.u32 %v551_v39, 7  ;;  %vm656_vm1 = vcmask 523264  }
  0x8f   : > { %4540 = vmatpush3.bf16.msra.mxu0 %v4701_v5  ;;  %4547 = vmatprep.mubr.msk.bf16.mxu0 %vm5422_vm0, %v5419_v4  ;;  %v5678_v12 = vld [vmem:[#allocation3 + $0x20] sm:$0xff]  ;;  %v710_v16 = vld [vmem:[#allocation3 + $0x30] sm:$0xff]  ;;  %s513_s21 = sand.u32 1, %s5387_s26   ;;  %s5888_s29 = sld [smem:[#allocation25_spill]] }
  0x90   : > { %s4511_s19 = sshll.u32 %s517_s22, 4  ;;  %4541 = vmatprep.subr.bf16.mxu0 %v5419_v4  ;;  %v4108_v13 = vcombine.low %v5676_v11, %v5678_v12  ;;  %v4109_v14 = vcombine.high %v5676_v11, %v5678_v12  ;;  %v4113_v17 = vcombine.high %v706_v15, %v710_v16  ;;  %v4112_v18 = vcombine.low %v706_v15, %v710_v16  ;;  %v714_v19 = vld [vmem:[#allocation3 + $0x50] sm:$0xff]  ;;  %v540_v43 = vld [vmem:[%s5841_s1] sm:$0xf]  ;;  %s5889_s25 = sld [smem:[#allocation21_spill]] }
  0x91   : > { %s523_s27 = scalar_lea.vmem %s5840_s0, %s4511_s19  ;;  %v718_v20 = vld [vmem:[#allocation3 + $0x70] sm:$0xff]  ;;  %v5687_v41 = vsub.s32 1, %v5684_v40  ;;  %v5690_v42 = vsub.s32 0, %v5684_v40  ;;  %v5696_v46 = vsub.s32 2, %v5684_v40  ;;  %v5702_v52 = vsub.s32 3, %v5684_v40  ;;  %v712_v15 = vld [vmem:[#allocation3 + $0x40] sm:$0xff] }
  0x92   : > { %v538_v2 = vld [vmem:[%s523_s27] sm:$0xff]  ;;  %v539_v3 = vld [vmem:[%s523_s27 + $0x8] sm:$0xff]  ;;  %1216 = vmatprep.subr.bf16.mxu1 %v4113_v17  ;;  %v4121_v21 = vcombine.high %v714_v19, %v718_v20  ;;  %v4120_v22 = vcombine.low %v714_v19, %v718_v20  ;;  %v722_v23 = vld [vmem:[#allocation3 + $0x90] sm:$0xff]  ;;  %s4508_s16 = sshll.u32 %s5395_s28, 4  ;;  %s514_s20 = scalar_lea.vmem [#allocation11], %s513_s21 }
  0x93   : > { %558 = vperm.xlu1 %4696, %v538_v2   ;;  %543 = vperm.xlu0 %4695, %v538_v2   ;;  %v726_v24 = vld [vmem:[#allocation3 + $0xb0] sm:$0xff]  ;;  %v568_v49 = vrot.slane %v540_v43, %v5687_v41  ;;  %v554_v50 = vrot.slane %v540_v43, %v5690_v42  ;;  %v584_v51 = vrot.slane %v540_v43, %v5696_v46  ;;  %v716_v16 = vld [vmem:[#allocation3 + $0x60] sm:$0xff]  ;;  %s3976_s13 = sshll.u32 %s514_s20, 4  ;;  %s5890_s12 = sld [smem:[#allocation26_spill]]  ;;  %s5795_s13 = int_to_ptr.vmem [resolvable:$true] %s3976_s13 }
  0x94   : > { %4542 = vmatpush3.bf16.msra.mxu0 %v4702_v7  ;;  %1217 = vmatpush1.bf16.msra.mxu1 %v4112_v18  ;;  %v4129_v25 = vcombine.high %v722_v23, %v726_v24  ;;  %v4128_v26 = vcombine.low %v722_v23, %v726_v24  ;;  %v730_v27 = vld [vmem:[#allocation3 + $0xd0] sm:$0xff]  ;;  %v600_v61 = vrot.slane %v540_v43, %v5702_v52  ;;  %v4101_v7 = vld [vmem:[%s5842_s2] ss:$0 sm:$0xff]  ;;  %s3964_s19 = scalar_lea.sflag [#allocation5], %s513_s21  ;;  %s5313_s24 = scalar_lea.vmem %s5795_s13, 16 }
  0x95   : > { %4543 = vmatprep.subr.bf16.mxu0 %v5419_v4  ;;  %1218 = vmatprep.subr.bf16.mxu1 %v4121_v21  ;;  %v734_v28 = vld [vmem:[#allocation3 + $0xf0] sm:$0xff]  ;;  %v4117_v20 = vcombine.high %v712_v15, %v716_v16  ;;  %v720_v21 = vld [vmem:[#allocation3 + $0x80] sm:$0xff]  ;;  %v4116_v23 = vcombine.low %v712_v15, %v716_v16  ;;  %v721_v15 = vld [vmem:[#allocation3 + $0x88] sm:$0xff]  ;;  %p5314_p1 = scmp.ne.s32.totalorder %s5795_s13, %s5313_s24  ;;  %s5423_s28 = smov [#allocation11]  }
  0x96   : > { %v4137_v29 = vcombine.high %v730_v27, %v734_v28  ;;  %v4136_v30 = vcombine.low %v730_v27, %v734_v28  ;;  %v738_v31 = vld [vmem:[#allocation3 + $0x110] sm:$0xff]  ;;  %v748_v11 = vld [vmem:[#allocation3 + $0x160] sm:$0xff]  ;;  %v725_v16 = vld [vmem:[#allocation3 + $0xa8] sm:$0xff]  ;;  %p5891_p10 = scmp.ne.s32.totalorder %s5889_s25, 0  ;;  %s5317_s15 = sshll.u32 %s5423_s28, 4  ;;  %s5318_s15 = int_to_ptr.vmem [resolvable:$false] %s5317_s15 }
  0x97   : > { %562 = vperm.xlu1 %4696, %v539_v3   ;;  %548 = vperm.xlu0 %4695, %v539_v3   ;;  %v742_v32 = vld [vmem:[#allocation3 + $0x130] sm:$0xff]  ;;  %s5319_s27 = scalar_lea.vmem %s5318_s15, 32  ;;  %p5320_p2 = scmp.lt.s32.totalorder %s5795_s13, %s5318_s15 }
  0x98   : > { %4544 = vmatpush3.bf16.msra.mxu0 %v4703_v9  ;;  %1219 = vmatpush1.bf16.msra.mxu1 %v4120_v22  ;;  %v4145_v33 = vcombine.high %v738_v31, %v742_v32  ;;  %v4144_v34 = vcombine.low %v738_v31, %v742_v32  ;;  %v746_v35 = vld [vmem:[#allocation3 + $0x150] sm:$0xff]  ;;  %v724_v22 = vld [vmem:[#allocation3 + $0xa0] sm:$0xff]  ;;  %p5315_p11 = pnand %p5314_p1, %p5891_p10  ;;  %p5321_p3 = scmp.lt.s32.totalorder %s5319_s27, %s5313_s24 }
  0x99   : > { %4545 = vmatprep.subr.bf16.mxu0 %v5419_v4  ;;  %1220 = vmatprep.subr.bf16.mxu1 %v4129_v25  ;;  %v750_v36 = vld [vmem:[#allocation3 + $0x170] sm:$0xff]  ;;  %v4125_v24 = vcombine.high %v720_v21, %v724_v22  ;;  %v728_v25 = vld [vmem:[#allocation3 + $0xc0] sm:$0xff]  ;;  %v4124_v27 = vcombine.low %v720_v21, %v724_v22  ;;  %v729_v21 = vld [vmem:[#allocation3 + $0xc8] sm:$0xff]  ;;  %s5793_s22 = scalar_lea.hbm %s5890_s12, %s4508_s16 }
  0x9a   : > { %v4153_v37 = vcombine.high %v746_v35, %v750_v36  ;;  %v4152_v38 = vcombine.low %v746_v35, %v750_v36  ;;  %v752_v35 = vld [vmem:[#allocation3 + $0x180] sm:$0xff]  ;;  %v758_v39 = vld [vmem:[#allocation3 + $0x1b0] sm:$0xff]  ;;  %v733_v22 = vld [vmem:[#allocation3 + $0xe8] sm:$0xff]  ;;  %p5316_p0 = pneg %p5315_p11  ;;  %p5322_p5 = por %p5321_p3, %p5320_p2 }
  0x9b   : > { %4698 = vset.pattern.permute.xlu1 %v5420_v6  ;;  %4697 = vset.pattern.permute.xlu0 %v5420_v6  ;;  %v756_v36 = vld [vmem:[#allocation3 + $0x1a0] sm:$0xff] }
  0x9c   : > { %578 = vperm.xlu1 %4698, %v539_v3   ;;  %574 = vperm.xlu0 %4697, %v538_v2   ;;  %v4156_v43 = vcombine.low %v752_v35, %v756_v36  ;;  %p5323_p6 = pnand %p5322_p5, %p5316_p0 }
  0x9d   : > { %4546 = vmatpush3.bf16.msra.mxu0 %v4704_v10  ;;  %1221 = vmatpush1.bf16.msra.mxu1 %v4128_v26  ;;  %v732_v26 = vld [vmem:[#allocation3 + $0xe0] sm:$0xff] }
  0x9e   : > { %1130 = vmatprep.subr.bf16.mxu0 %v4109_v14  ;;  %1222 = vmatprep.subr.bf16.mxu1 %v4137_v29  ;;  %v4133_v28 = vcombine.high %v728_v25, %v732_v26  ;;  %v736_v29 = vld [vmem:[#allocation3 + $0x100] sm:$0xff]  ;;  %v4132_v31 = vcombine.low %v728_v25, %v732_v26  ;;  %v4135_v25 = vcombine.high %v729_v21, %v733_v22 }
  0x9f   : > { %v4717_v26 = vld [vmem:[#allocation6 + $0x40] ss:$16 sps:$4 sm:$0xff]  }
  0xa0   : > { %4699 = vset.pattern.permute.xlu1 %v5421_v8  ;;  %4700 = vset.pattern.permute.xlu0 %v5421_v8 }
  0xa1   : > { %590 = vperm.xlu1 %4699, %v538_v2   ;;  %594 = vperm.xlu0 %4700, %v539_v3  }
  0xa2   : > { %1223 = vmatpush1.bf16.msra.mxu1 %v4136_v30  ;;  %v740_v30 = vld [vmem:[#allocation3 + $0x120] sm:$0xff] }
  0xa3   : > { %1224 = vmatprep.subr.bf16.mxu1 %v4145_v33  ;;  %v4141_v32 = vcombine.high %v736_v29, %v740_v30  ;;  %v744_v33 = vld [vmem:[#allocation3 + $0x140] sm:$0xff]  ;;  %v4140_v12 = vcombine.low %v736_v29, %v740_v30  ;;  %v4134_v30 = vcombine.low %v729_v21, %v733_v22 }
  0xa4   : > { %v4725_v29 = vld [vmem:[#allocation6 + $0x64] ss:$16 sps:$4 sm:$0xff]  }
  0xa6   : > { %1225 = vmatpush1.bf16.msra.mxu1 %v4144_v34  ;;  %v4148_v34 = vcombine.low %v744_v33, %v748_v11 }
  0xa7   : > { %1226 = vmatprep.subr.bf16.mxu1 %v4153_v37  ;;  %v4157_v37 = vcombine.high %v752_v35, %v756_v36  ;;  %v4729_v35 = vld [vmem:[#allocation6 + $0x80] ss:$16 sps:$4 sm:$0xff]   ;;  %v753_v36 = vld [vmem:[#allocation3 + $0x188] sm:$0xff] }
  0xaa   : > { %1227 = vmatpush1.bf16.msra.mxu1 %v4152_v38  ;;  %v754_v38 = vld [vmem:[#allocation3 + $0x190] sm:$0xff] }
 0x112   : > { %v559_v44 = vpop.permute.xlu1 %558  ;;  %v544_v45 = vpop.permute.xlu0 %543 }
 0x113   : > { %v569_v53 = vmul.f32 %v568_v49, %v559_v44  ;;  %v555_v54 = vmul.f32 %v554_v50, %v544_v45  ;;  %v4161_v44 = vcombine.high %v754_v38, %v758_v39  ;;  %v4160_v45 = vcombine.low %v754_v38, %v758_v39  ;;  %v4737_v38 = vld [vmem:[#allocation6 + $0xa4] ss:$16 sps:$4 sm:$0xff]  }
 0x115   : > { %v571_v62 = vadd.f32 %v569_v53, %v555_v54  ;;  %1228 = vmatprep.subr.bf16.mxu1 %v4161_v44  ;;  %v4735_v44 = vld [vmem:[#allocation6 + $0xa0] ss:$16 sps:$4 sm:$0xff]  }
 0x116   : > { %v563_v47 = vpop.permute.xlu1 %562  ;;  %v549_v48 = vpop.permute.xlu0 %548  ;;  %1229 = vmatpush1.bf16.msra.mxu1 %v4160_v45  ;;  %v761_v45 = vld [vmem:[#allocation3 + $0x1c8] sm:$0xff] }
 0x117   : > { %v570_v55 = vmul.f32 %v568_v49, %v563_v47  ;;  %v556_v56 = vmul.f32 %v554_v50, %v549_v48  ;;  %v760_v47 = vld [vmem:[#allocation3 + $0x1c0] sm:$0xff]  ;;  %v762_v50 = vld [vmem:[#allocation3 + $0x1d0] sm:$0xff] }
 0x118   : > { %v764_v48 = vld [vmem:[#allocation3 + $0x1e0] sm:$0xff] }
 0x119   : > { %v572_v63 = vadd.f32 %v570_v55, %v556_v56  ;;  %v4165_v49 = vcombine.high %v760_v47, %v764_v48  ;;  %v4164_v53 = vcombine.low %v760_v47, %v764_v48  ;;  %v705_v56 = vld [vmem:[#allocation3 + $0x8] sm:$0xff]  ;;  %v4743_v48 = vld [vmem:[#allocation6 + $0xc4] ss:$16 sps:$4 sm:$0xff]  }
 0x11a   : > { %v765_v47 = vld [vmem:[#allocation3 + $0x1e8] sm:$0xff] }
 0x11b   : > { %v579_v57 = vpop.permute.xlu1 %578  ;;  %v575_v58 = vpop.permute.xlu0 %574 }
 0x11c   : > { %v586_v59 = vmul.f32 %v584_v51, %v579_v57  ;;  %v585_v60 = vmul.f32 %v584_v51, %v575_v58  ;;  %v766_v51 = vld [vmem:[#allocation3 + $0x1f0] sm:$0xff]  ;;  %v709_v57 = vld [vmem:[#allocation3 + $0x28] sm:$0xff] }
 0x11d   : > { %v4169_v54 = vcombine.high %v762_v50, %v766_v51  ;;  %v4168_v55 = vcombine.low %v762_v50, %v766_v51  ;;  %v4111_v58 = vcombine.high %v705_v56, %v709_v57  ;;  %v4167_v50 = vcombine.high %v761_v45, %v765_v47  ;;  %v4741_v51 = vld [vmem:[#allocation6 + $0xc0] ss:$16 sps:$4 sm:$0xff]  }
 0x11e   : > { %v588_v3 = vadd.f32 %v586_v59, %v572_v63  ;;  %v587_v4 = vadd.f32 %v585_v60, %v571_v62  ;;  %v4110_v59 = vcombine.low %v705_v56, %v709_v57  ;;  %v4707_v60 = vld [vmem:[#allocation6 + $0x4] ss:$16 sps:$4 sm:$0xff]   ;;  %v4166_v56 = vcombine.low %v761_v45, %v765_v47  ;;  %v4765_v45 = vld [vmem:[#allocation6 + $0x140] ss:$16 sps:$4 sm:$0xff]   ;;  %v4744_v47 = vld [vmem:[#allocation6 + $0xc8] ss:$16 sps:$4 sm:$0xff]  }
 0x11f   : > { %1230 = vmatprep.subr.bf16.mxu1 %v4169_v54  ;;  %v711_v54 = vld [vmem:[#allocation3 + $0x38] sm:$0xff] }
 0x120   : > { %v591_v0 = vpop.permute.xlu1 %590  ;;  %v595_v2 = vpop.permute.xlu0 %594  ;;  %1231 = vmatpush1.bf16.msra.mxu1 %v4168_v55  ;;  %v4749_v55 = vld [vmem:[#allocation6 + $0xe4] ss:$16 sps:$4 sm:$0xff]  }
 0x121   : > { %v601_v5 = vmul.f32 %v600_v61, %v591_v0  ;;  %v602_v6 = vmul.f32 %v600_v61, %v595_v2  ;;  %2975 = vmatprep.subr.bf16.mxu1 %v4707_v60  ;;  %v4102_v61 = vld [vmem:[%s5844_s4] ss:$0 sm:$0xff]  ;;  %v719_v60 = vld [vmem:[#allocation3 + $0x78] sm:$0xff] }
 0x123   : > { %v603_v8 = vadd.f32 %v601_v5, %v587_v4  ;;  %v604_v9 = vadd.f32 %v602_v6, %v588_v3  ;;  %v713_v5 = vld [vmem:[#allocation3 + $0x48] sm:$0xff] }
 0x124   : > { %v717_v6 = vld [vmem:[#allocation3 + $0x68] sm:$0xff] }
 0x125   : > { %v612_v10 = vadd.f32 %v4101_v7, %v603_v8  ;;  %v613_v14 = vadd.f32 %v4101_v7, %v604_v9 }
 0x127   : > { %v614_v17 = vmax.f32 %v612_v10, 0.0  ;;  %v615_v18 = vmax.f32 %v613_v14, 0.0  ;;  %v4119_v10 = vcombine.high %v713_v5, %v717_v6  ;;  %v4705_v14 = vld [vmem:[#allocation6] ss:$16 sps:$4 sm:$0xff]  }
 0x129   : > { %v616_v19 = vpack.c.bf16 %v615_v18, %v614_v17  ;;  %v4713_v17 = vld [vmem:[#allocation6 + $0x24] ss:$16 sps:$4 sm:$0xff]   ;;  %v4118_v18 = vcombine.low %v713_v5, %v717_v6 }
 0x12b   : > { %4548 = vmatmul.mubr.msk.bf16.vlgmr.msra.gmra.mrb[0].mxu0 %vm656_vm1, %v616_v19  ;;  %v4127_v19 = vcombine.high %v721_v15, %v725_v16 }
 0x12c   : > { %1131 = vmatpush1.bf16.msra.mxu0 %v4108_v13  ;;  %1162 = vmatprep.mubr.bf16.mxu0 %v5418_v1  ;;  %v4149_v13 = vcombine.high %v744_v33, %v748_v11  ;;  %v745_v33 = vld [vmem:[#allocation3 + $0x148] sm:$0xff] }
 0x12d   : > { %1132 = vmatprep.subr.bf16.mxu0 %v4117_v20  ;;  %v4711_v20 = vld [vmem:[#allocation6 + $0x20] ss:$16 sps:$4 sm:$0xff]   ;;  %v749_v11 = vld [vmem:[#allocation3 + $0x168] sm:$0xff] }
 0x12e   : > { %v4150_v39 = vcombine.low %v745_v33, %v749_v11 }
 0x130   : > { %1133 = vmatpush1.bf16.msra.mxu0 %v4116_v23  ;;  %v4719_v23 = vld [vmem:[#allocation6 + $0x44] ss:$16 sps:$4 sm:$0xff]  }
 0x131   : > { %1134 = vmatprep.subr.bf16.mxu0 %v4125_v24  ;;  %v4126_v24 = vcombine.low %v721_v15, %v725_v16  ;;  %v739_v16 = vld [vmem:[#allocation3 + $0x118] sm:$0xff] }
 0x134   : > { %1135 = vmatpush1.bf16.msra.mxu0 %v4124_v27  ;;  %v737_v27 = vld [vmem:[#allocation3 + $0x108] sm:$0xff] }
 0x135   : > { %1136 = vmatprep.subr.bf16.mxu0 %v4133_v28  ;;  %v741_v28 = vld [vmem:[#allocation3 + $0x128] sm:$0xff] }
 0x138   : > { %1137 = vmatpush1.bf16.msra.mxu0 %v4132_v31  ;;  %v4143_v31 = vcombine.high %v737_v27, %v741_v28 }
 0x139   : > { %1138 = vmatprep.subr.bf16.mxu0 %v4141_v32  ;;  %v4723_v32 = vld [vmem:[#allocation6 + $0x60] ss:$16 sps:$4 sm:$0xff]  }
 0x13c   : > { %1139 = vmatpush1.bf16.msra.mxu0 %v4140_v12  ;;  %v4731_v12 = vld [vmem:[#allocation6 + $0x84] ss:$16 sps:$4 sm:$0xff]  }
 0x13d   : > { %1140 = vmatprep.subr.bf16.mxu0 %v4149_v13  ;;  %v4142_v13 = vcombine.low %v737_v27, %v741_v28  ;;  %v763_v27 = vld [vmem:[#allocation3 + $0x1d8] sm:$0xff] }
 0x13e   : > { %v767_v28 = vld [vmem:[#allocation3 + $0x1f8] sm:$0xff] }
 0x140   : > { %1141 = vmatpush1.bf16.msra.mxu0 %v4148_v34  ;;  %v4151_v34 = vcombine.high %v745_v33, %v749_v11  ;;  %v4708_v33 = vld [vmem:[#allocation6 + $0x8] ss:$16 sps:$4 sm:$0xff]   ;;  %v4716_v11 = vld [vmem:[#allocation6 + $0x2c] ss:$16 sps:$4 sm:$0xff]  }
 0x141   : > { %1142 = vmatprep.subr.bf16.mxu0 %v4157_v37  ;;  %v757_v37 = vld [vmem:[#allocation3 + $0x1a8] sm:$0xff] }
 0x144   : > { %1143 = vmatpush1.bf16.msra.mxu0 %v4156_v43  ;;  %v4159_v43 = vcombine.high %v753_v36, %v757_v37 }
 0x145   : > { %1144 = vmatprep.subr.bf16.mxu0 %v4165_v49  ;;  %v4158_v49 = vcombine.low %v753_v36, %v757_v37  ;;  %v4726_v36 = vld [vmem:[#allocation6 + $0x68] ss:$16 sps:$4 sm:$0xff]   ;;  %v4734_v37 = vld [vmem:[#allocation6 + $0x8c] ss:$16 sps:$4 sm:$0xff]  }
 0x148   : > { %1145 = vmatpush1.bf16.msra.mxu0 %v4164_v53  ;;  %v707_v53 = vld [vmem:[#allocation3 + $0x18] sm:$0xff] }
 0x149   : > { %1173 = vmatprep.subr.bf16.mxu0 %v4111_v58  ;;  %v4115_v57 = vcombine.high %v707_v53, %v711_v54  ;;  %v4747_v58 = vld [vmem:[#allocation6 + $0xe0] ss:$16 sps:$4 sm:$0xff]  }
 0x1fe   : > { %v694_v62 = vpop.f32.mrb[0].mxu0 }
 0x1ff   : > { %v695_v63 = vadd.f32 %v4102_v61, %v694_v62  ;;  %v4549_v0 = vpop.f32.mrb[1].mxu0  ;;  %v4114_v62 = vcombine.low %v707_v53, %v711_v54  ;;  %v4758_v53 = vld [vmem:[#allocation6 + $0x10c] ss:$16 sps:$4 sm:$0xff]   ;;  %v4779_v54 = vld [vmem:[#allocation6 + $0x184] ss:$16 sps:$4 sm:$0xff]  }
 0x200   : > { %v697_v2 = vpop.f32.mrb[2].mxu0  ;;  %v4753_v0 = vld [vmem:[#allocation6 + $0x100] ss:$16 sps:$4 sm:$0xff]  }
 0x201   : > { %v698_v3 = vadd.f32 %v4102_v61, %v697_v2  ;;  %v4550_v4 = vpop.f32.mrb[3].mxu0  ;;  %v701_v7 = vmax.f32 %v695_v63, 0.0  ;;  %v4755_v61 = vld [vmem:[#allocation6 + $0x104] ss:$16 sps:$4 sm:$0xff]   ;;  %v723_v2 = vld [vmem:[#allocation3 + $0x98] sm:$0xff] }
 0x202   : > { %v4761_v4 = vld [vmem:[#allocation6 + $0x124] ss:$16 sps:$4 sm:$0xff]  }
 0x203   : > { %v702_v8 = vmax.f32 %v698_v3, 0.0  ;;  %v727_v3 = vld [vmem:[#allocation3 + $0xb8] sm:$0xff] }
 0x204   : > { %v4131_v6 = vcombine.high %v723_v2, %v727_v3 }
 0x205   : > { %v5715_v9 = vpack.c.bf16 %v702_v8, %v701_v7  ;;  %v4759_v7 = vld [vmem:[#allocation6 + $0x120] ss:$16 sps:$4 sm:$0xff]   ;;  %v731_v8 = vld [vmem:[#allocation3 + $0xd8] sm:$0xff] }
 0x207   : > { %1163 = vmatmul.mubr.bf16.vlgmr.msra.gmra.mrb[4].mxu0 %v5715_v9  ;;  %1249 = vmatmul.mubr.bf16.vlgmr.msra.gmra.mrb[0].mxu1 %v5715_v9 }
 0x208   : > { %1174 = vmatpush1.bf16.msra.mxu0 %v4110_v59  ;;  %1205 = vmatprep.mubr.bf16.mxu0 %v5418_v1  ;;  %v715_v59 = vld [vmem:[#allocation3 + $0x58] sm:$0xff] }
 0x209   : > { %1175 = vmatprep.subr.bf16.mxu0 %v4119_v10  ;;  %2976 = vmatpush1.bf16.msra.mxu1 %v4705_v14  ;;  %v4123_v63 = vcombine.high %v715_v59, %v719_v60  ;;  %v4122_v5 = vcombine.low %v715_v59, %v719_v60  ;;  %v735_v10 = vld [vmem:[#allocation3 + $0xf8] sm:$0xff]  ;;  %v4130_v14 = vcombine.low %v723_v2, %v727_v3  ;;  %v4783_v59 = vld [vmem:[#allocation6 + $0x1a0] ss:$16 sps:$4 sm:$0xff]  }
 0x20a   : > { %2977 = vmatprep.subr.bf16.mxu1 %v4713_v17  ;;  %v4139_v15 = vcombine.high %v731_v8, %v735_v10  ;;  %v743_v17 = vld [vmem:[#allocation3 + $0x138] sm:$0xff]  ;;  %v4795_v3 = vld [vmem:[#allocation6 + $0x1e0] ss:$16 sps:$4 sm:$0xff]  }
 0x20b   : > { %v4146_v21 = vcombine.low %v739_v16, %v743_v17  ;;  %v4762_v60 = vld [vmem:[#allocation6 + $0x128] ss:$16 sps:$4 sm:$0xff]  }
 0x20c   : > { %1176 = vmatpush1.bf16.msra.mxu0 %v4118_v18  ;;  %v4138_v18 = vcombine.low %v731_v8, %v735_v10  ;;  %v4768_v2 = vld [vmem:[#allocation6 + $0x148] ss:$16 sps:$4 sm:$0xff]   ;;  %v4788_v10 = vld [vmem:[#allocation6 + $0x1ac] ss:$16 sps:$4 sm:$0xff]  }
 0x20d   : > { %1177 = vmatprep.subr.bf16.mxu0 %v4127_v19  ;;  %2978 = vmatpush1.bf16.msra.mxu1 %v4711_v20  ;;  %v4147_v19 = vcombine.high %v739_v16, %v743_v17  ;;  %v747_v20 = vld [vmem:[#allocation3 + $0x158] sm:$0xff] }
 0x20e   : > { %2979 = vmatprep.subr.bf16.mxu1 %v4719_v23  ;;  %v755_v23 = vld [vmem:[#allocation3 + $0x198] sm:$0xff] }
 0x20f   : > { %v4780_v8 = vld [vmem:[#allocation6 + $0x188] ss:$16 sps:$4 sm:$0xff]   ;;  %v4800_v17 = vld [vmem:[#allocation6 + $0x1ec] ss:$16 sps:$4 sm:$0xff]  }
 0x210   : > { %1178 = vmatpush1.bf16.msra.mxu0 %v4126_v24  ;;  %v759_v24 = vld [vmem:[#allocation3 + $0x1b8] sm:$0xff] }
 0x211   : > { %1179 = vmatprep.subr.bf16.mxu0 %v4135_v25  ;;  %2980 = vmatpush1.bf16.msra.mxu1 %v4717_v26  ;;  %v4163_v26 = vcombine.high %v755_v23, %v759_v24  ;;  %v4792_v16 = vld [vmem:[#allocation6 + $0x1c8] ss:$16 sps:$4 sm:$0xff]  }
 0x212   : > { %2981 = vmatprep.subr.bf16.mxu1 %v4725_v29  ;;  %v4162_v29 = vcombine.low %v755_v23, %v759_v24 }
 0x214   : > { %1180 = vmatpush1.bf16.msra.mxu0 %v4134_v30  ;;  %v4171_v30 = vcombine.high %v763_v27, %v767_v28 }
 0x215   : > { %1181 = vmatprep.subr.bf16.mxu0 %v4143_v31  ;;  %2982 = vmatpush1.bf16.msra.mxu1 %v4723_v32  ;;  %v4170_v31 = vcombine.low %v763_v27, %v767_v28  ;;  %v4710_v32 = vld [vmem:[#allocation6 + $0xc] ss:$16 sps:$4 sm:$0xff]  }
 0x216   : > { %2983 = vmatprep.subr.bf16.mxu1 %v4731_v12  ;;  %v4714_v12 = vld [vmem:[#allocation6 + $0x28] ss:$16 sps:$4 sm:$0xff]  }
 0x218   : > { %1182 = vmatpush1.bf16.msra.mxu0 %v4142_v13  ;;  %v4722_v13 = vld [vmem:[#allocation6 + $0x4c] ss:$16 sps:$4 sm:$0xff]  }
 0x219   : > { %1183 = vmatprep.subr.bf16.mxu0 %v4151_v34  ;;  %2984 = vmatpush1.bf16.msra.mxu1 %v4729_v35  ;;  %v4720_v34 = vld [vmem:[#allocation6 + $0x48] ss:$16 sps:$4 sm:$0xff]   ;;  %v4728_v35 = vld [vmem:[#allocation6 + $0x6c] ss:$16 sps:$4 sm:$0xff]  }
 0x21a   : > { %2985 = vmatprep.subr.bf16.mxu1 %v4737_v38  ;;  %v4732_v38 = vld [vmem:[#allocation6 + $0x88] ss:$16 sps:$4 sm:$0xff]  }
 0x21c   : > { %1184 = vmatpush1.bf16.msra.mxu0 %v4150_v39  ;;  %v4740_v39 = vld [vmem:[#allocation6 + $0xac] ss:$16 sps:$4 sm:$0xff]  }
 0x21d   : > { %1185 = vmatprep.subr.bf16.mxu0 %v4159_v43  ;;  %2986 = vmatpush1.bf16.msra.mxu1 %v4735_v44  ;;  %v4738_v43 = vld [vmem:[#allocation6 + $0xa8] ss:$16 sps:$4 sm:$0xff]   ;;  %v4767_v44 = vld [vmem:[#allocation6 + $0x144] ss:$16 sps:$4 sm:$0xff]  }
 0x21e   : > { %2987 = vmatprep.subr.bf16.mxu1 %v4743_v48  ;;  %v4752_v48 = vld [vmem:[#allocation6 + $0xec] ss:$16 sps:$4 sm:$0xff]  }
 0x220   : > { %1186 = vmatpush1.bf16.msra.mxu0 %v4158_v49  ;;  %v4773_v49 = vld [vmem:[#allocation6 + $0x164] ss:$16 sps:$4 sm:$0xff]  }
 0x221   : > { %1187 = vmatprep.subr.bf16.mxu0 %v4167_v50  ;;  %2988 = vmatpush1.bf16.msra.mxu1 %v4741_v51  ;;  %v4771_v50 = vld [vmem:[#allocation6 + $0x160] ss:$16 sps:$4 sm:$0xff]   ;;  %v4750_v51 = vld [vmem:[#allocation6 + $0xe8] ss:$16 sps:$4 sm:$0xff]  }
 0x222   : > { %2989 = vmatprep.subr.bf16.mxu1 %v4749_v55  ;;  %v4777_v55 = vld [vmem:[#allocation6 + $0x180] ss:$16 sps:$4 sm:$0xff]  }
 0x224   : > { %1188 = vmatpush1.bf16.msra.mxu0 %v4166_v56  ;;  %v4756_v56 = vld [vmem:[#allocation6 + $0x108] ss:$16 sps:$4 sm:$0xff]  }
 0x225   : > { %1259 = vmatprep.subr.bf16.mxu0 %v4115_v57  ;;  %2990 = vmatpush1.bf16.msra.mxu1 %v4747_v58  ;;  %v4764_v57 = vld [vmem:[#allocation6 + $0x12c] ss:$16 sps:$4 sm:$0xff]   ;;  %v4785_v58 = vld [vmem:[#allocation6 + $0x1a4] ss:$16 sps:$4 sm:$0xff]  }
 0x226   : > { %2991 = vmatprep.subr.bf16.mxu1 %v4755_v61  ;;  %v4770_v61 = vld [vmem:[#allocation6 + $0x14c] ss:$16 sps:$4 sm:$0xff]  }
 0x227   : > { %1206 = vmatmul.mubr.bf16.vlgmr.msra.gmra.mrb[8].mxu0 %v5715_v9 }
 0x228   : > { %1260 = vmatpush1.bf16.msra.mxu0 %v4114_v62  ;;  %1291 = vmatprep.mubr.bf16.mxu0 %v5418_v1  ;;  %v751_v1 = vld [vmem:[#allocation3 + $0x178] sm:$0xff]  ;;  %v4791_v62 = vld [vmem:[#allocation6 + $0x1c4] ss:$16 sps:$4 sm:$0xff]  }
 0x229   : > { %1261 = vmatprep.subr.bf16.mxu0 %v4123_v63  ;;  %2992 = vmatpush1.bf16.msra.mxu1 %v4753_v0  ;;  %v4155_v22 = vcombine.high %v747_v20, %v751_v1  ;;  %v4154_v25 = vcombine.low %v747_v20, %v751_v1  ;;  %v4789_v63 = vld [vmem:[#allocation6 + $0x1c0] ss:$16 sps:$4 sm:$0xff]   ;;  %v4797_v0 = vld [vmem:[#allocation6 + $0x1e4] ss:$16 sps:$4 sm:$0xff]   ;;  %v788_v20 = vsub.s32 4, %v5684_v40 }
 0x22a   : > { %2993 = vmatprep.subr.bf16.mxu1 %v4761_v4  ;;  %v4776_v4 = vld [vmem:[#allocation6 + $0x16c] ss:$16 sps:$4 sm:$0xff]   ;;  %v5727_v1 = vld [vmem:[%s5846_s6] sm:$0xff] }
 0x22b   : > { %v789_v23 = vrot.slane %v5727_v1, %v788_v20  ;;  %v777_v24 = vrot.slane %v5727_v1, %v5687_v41  ;;  %v4813_v20 = vld [vmem:[#allocation6 + $0x240] ss:$16 sps:$4 sm:$0xff]  }
 0x22c   : > { %1262 = vmatpush1.bf16.msra.mxu0 %v4122_v5  ;;  %v4774_v5 = vld [vmem:[#allocation6 + $0x168] ss:$16 sps:$4 sm:$0xff]  }
 0x22d   : > { %1263 = vmatprep.subr.bf16.mxu0 %v4131_v6  ;;  %2994 = vmatpush1.bf16.msra.mxu1 %v4759_v7  ;;  %v4782_v6 = vld [vmem:[#allocation6 + $0x18c] ss:$16 sps:$4 sm:$0xff]   ;;  %v4803_v7 = vld [vmem:[#allocation6 + $0x204] ss:$16 sps:$4 sm:$0xff]  }
 0x22e   : > { %2995 = vmatprep.subr.bf16.mxu1 %v4767_v44 }
 0x230   : > { %1264 = vmatpush1.bf16.msra.mxu0 %v4130_v14  ;;  %v4786_v14 = vld [vmem:[#allocation6 + $0x1a8] ss:$16 sps:$4 sm:$0xff]  }
 0x231   : > { %1265 = vmatprep.subr.bf16.mxu0 %v4139_v15  ;;  %2996 = vmatpush1.bf16.msra.mxu1 %v4765_v45  ;;  %v4794_v15 = vld [vmem:[#allocation6 + $0x1cc] ss:$16 sps:$4 sm:$0xff]  }
 0x232   : > { %2997 = vmatprep.subr.bf16.mxu1 %v4773_v49 }
 0x234   : > { %1266 = vmatpush1.bf16.msra.mxu0 %v4138_v18  ;;  %v4798_v18 = vld [vmem:[#allocation6 + $0x1e8] ss:$16 sps:$4 sm:$0xff]  }
 0x235   : > { %1267 = vmatprep.subr.bf16.mxu0 %v4147_v19  ;;  %2998 = vmatpush1.bf16.msra.mxu1 %v4771_v50  ;;  %v4806_v19 = vld [vmem:[#allocation6 + $0x20c] ss:$16 sps:$4 sm:$0xff]  }
 0x236   : > { %2999 = vmatprep.subr.bf16.mxu1 %v4779_v54 }
 0x238   : > { %1268 = vmatpush1.bf16.msra.mxu0 %v4146_v21  ;;  %v792_v21 = vsub.s32 5, %v5684_v40 }
 0x239   : > { %1269 = vmatprep.subr.bf16.mxu0 %v4155_v22  ;;  %3000 = vmatpush1.bf16.msra.mxu1 %v4777_v55  ;;  %v773_v22 = vrot.slane %v5727_v1, %v5690_v42 }
 0x23a   : > { %3001 = vmatprep.subr.bf16.mxu1 %v4785_v58 }
 0x23c   : > { %1270 = vmatpush1.bf16.msra.mxu0 %v4154_v25  ;;  %v793_v25 = vrot.slane %v5727_v1, %v792_v21  ;;  %v4816_v21 = vld [vmem:[#allocation6 + $0x248] ss:$16 sps:$4 sm:$0xff]  }
 0x23d   : > { %1271 = vmatprep.subr.bf16.mxu0 %v4163_v26  ;;  %3002 = vmatpush1.bf16.msra.mxu1 %v4783_v59 }
 0x23e   : > { %3003 = vmatprep.subr.bf16.mxu1 %v4791_v62 }
 0x240   : > { %1272 = vmatpush1.bf16.msra.mxu0 %v4162_v29 }
 0x241   : > { %1273 = vmatprep.subr.bf16.mxu0 %v4171_v30  ;;  %3004 = vmatpush1.bf16.msra.mxu1 %v4789_v63 }
 0x242   : > { %3005 = vmatprep.subr.bf16.mxu1 %v4797_v0 }
 0x244   : > { %1274 = vmatpush1.bf16.msra.mxu0 %v4170_v31 }
 0x245   : > { %3139 = vmatprep.subr.bf16.mxu0 %v4710_v32  ;;  %3006 = vmatpush1.bf16.msra.mxu1 %v4795_v3 }
 0x246   : > { %3016 = vmatprep.subr.bf16.mxu1 %v4803_v7 }
 0x247   : > { %1292 = vmatmul.mubr.bf16.vlgmr.msra.gmra.mrb[12].mxu0 %v5715_v9  ;;  %v4746_v9 = vld [vmem:[#allocation6 + $0xcc] ss:$16 sps:$4 sm:$0xff]  }
 0x248   : > { %3140 = vmatpush1.bf16.msra.mxu0 %v4708_v33 }
 0x249   : > { %3141 = vmatprep.subr.bf16.mxu0 %v4716_v11 }
 0x24c   : > { %3142 = vmatpush1.bf16.msra.mxu0 %v4714_v12 }
 0x24d   : > { %3143 = vmatprep.subr.bf16.mxu0 %v4722_v13 }
 0x250   : > { %3144 = vmatpush1.bf16.msra.mxu0 %v4720_v34 }
 0x251   : > { %3145 = vmatprep.subr.bf16.mxu0 %v4728_v35 }
 0x254   : > { %3146 = vmatpush1.bf16.msra.mxu0 %v4726_v36 }
 0x255   : > { %3147 = vmatprep.subr.bf16.mxu0 %v4734_v37 }
 0x258   : > { %3148 = vmatpush1.bf16.msra.mxu0 %v4732_v38 }
 0x259   : > { %3149 = vmatprep.subr.bf16.mxu0 %v4740_v39 }
 0x25c   : > { %3150 = vmatpush1.bf16.msra.mxu0 %v4738_v43 }
 0x25d   : > { %3151 = vmatprep.subr.bf16.mxu0 %v4746_v9 }
 0x260   : > { %3152 = vmatpush1.bf16.msra.mxu0 %v4744_v47 }
 0x261   : > { %3153 = vmatprep.subr.bf16.mxu0 %v4752_v48 }
 0x264   : > { %3154 = vmatpush1.bf16.msra.mxu0 %v4750_v51 }
 0x265   : > { %3155 = vmatprep.subr.bf16.mxu0 %v4758_v53 }
 0x268   : > { %3156 = vmatpush1.bf16.msra.mxu0 %v4756_v56 }
 0x269   : > { %3157 = vmatprep.subr.bf16.mxu0 %v4764_v57 }
 0x26c   : > { %3158 = vmatpush1.bf16.msra.mxu0 %v4762_v60 }
 0x26d   : > { %3159 = vmatprep.subr.bf16.mxu0 %v4770_v61 }
 0x270   : > { %3160 = vmatpush1.bf16.msra.mxu0 %v4768_v2 }
 0x271   : > { %3161 = vmatprep.subr.bf16.mxu0 %v4776_v4 }
 0x274   : > { %3162 = vmatpush1.bf16.msra.mxu0 %v4774_v5  ;;  %v4801_v5 = vld [vmem:[#allocation6 + $0x200] ss:$16 sps:$4 sm:$0xff]  }
 0x275   : > { %3163 = vmatprep.subr.bf16.mxu0 %v4782_v6  ;;  %v4804_v6 = vld [vmem:[#allocation6 + $0x208] ss:$16 sps:$4 sm:$0xff]  }
 0x278   : > { %3164 = vmatpush1.bf16.msra.mxu0 %v4780_v8  ;;  %v4809_v8 = vld [vmem:[#allocation6 + $0x224] ss:$16 sps:$4 sm:$0xff]  }
 0x279   : > { %3165 = vmatprep.subr.bf16.mxu0 %v4788_v10  ;;  %v4812_v10 = vld [vmem:[#allocation6 + $0x22c] ss:$16 sps:$4 sm:$0xff]  }
 0x27c   : > { %3166 = vmatpush1.bf16.msra.mxu0 %v4786_v14  ;;  %v4807_v14 = vld [vmem:[#allocation6 + $0x220] ss:$16 sps:$4 sm:$0xff]  }
 0x27d   : > { %3167 = vmatprep.subr.bf16.mxu0 %v4794_v15  ;;  %v4810_v15 = vld [vmem:[#allocation6 + $0x228] ss:$16 sps:$4 sm:$0xff]  }
 0x280   : > { %3168 = vmatpush1.bf16.msra.mxu0 %v4792_v16  ;;  %v4815_v16 = vld [vmem:[#allocation6 + $0x244] ss:$16 sps:$4 sm:$0xff]  }
 0x281   : > { %3169 = vmatprep.subr.bf16.mxu0 %v4800_v17  ;;  %v4818_v17 = vld [vmem:[#allocation6 + $0x24c] ss:$16 sps:$4 sm:$0xff]  }
 0x284   : > { %3170 = vmatpush1.bf16.msra.mxu0 %v4798_v18  ;;  %v781_v18 = vrot.slane %v5727_v1, %v5696_v46 }
 0x285   : > { %3180 = vmatprep.subr.bf16.mxu0 %v4806_v19  ;;  %v785_v19 = vrot.slane %v5727_v1, %v5702_v52 }
 0x2da   : > { %v1164_v26 = vpop.f32.mrb[4].mxu0  ;;  %v1250_v27 = vpop.f32.mrb[0].mxu1 }
 0x2db   : > { %v1165_v28 = vadd.f32 %v1164_v26, %v773_v22  ;;  %v1251_v29 = vadd.f32 %v1250_v27, %v789_v23  ;;  %v1166_v30 = vpop.f32.mrb[5].mxu0  ;;  %v1252_v31 = vpop.f32.mrb[1].mxu1 }
 0x2dc   : > { %v1167_v32 = vadd.f32 %v1166_v30, %v777_v24  ;;  %v1253_v33 = vadd.f32 %v1252_v31, %v793_v25  ;;  %v1168_v11 = vpop.f32.mrb[6].mxu0  ;;  %v1254_v12 = vpop.f32.mrb[2].mxu1  ;;  %v4822_v30 = vld [vmem:[#allocation6 + $0x268] ss:$16 sps:$4 sm:$0xff]  }
 0x2dd   : > { %v1169_v13 = vadd.f32 %v1168_v11, %v773_v22  ;;  %v1255_v34 = vadd.f32 %v1254_v12, %v789_v23  ;;  %v1170_v35 = vpop.f32.mrb[7].mxu0  ;;  %v1256_v36 = vpop.f32.mrb[3].mxu1  ;;  %v1302_v39 = vmax.f32 %v1165_v28, 0.0  ;;  %v1306_v43 = vmax.f32 %v1251_v29, 0.0  ;;  %v4821_v22 = vld [vmem:[#allocation6 + $0x264] ss:$16 sps:$4 sm:$0xff]  }
 0x2de   : > { %v1171_v37 = vadd.f32 %v1170_v35, %v777_v24  ;;  %v1257_v38 = vadd.f32 %v1256_v36, %v793_v25  ;;  %v1303_v45 = vmax.f32 %v1167_v32, 0.0  ;;  %v1307_v47 = vmax.f32 %v1253_v33, 0.0  ;;  %v4824_v23 = vld [vmem:[#allocation6 + $0x26c] ss:$16 sps:$4 sm:$0xff]   ;;  %v4819_v29 = vld [vmem:[#allocation6 + $0x260] ss:$16 sps:$4 sm:$0xff]  }
 0x2df   : > { %v1310_v9 = vmax.f32 %v1169_v13, 0.0  ;;  %v1314_v44 = vmax.f32 %v1255_v34, 0.0  ;;  %v4827_v33 = vld [vmem:[#allocation6 + $0x284] ss:$16 sps:$4 sm:$0xff]   ;;  %v4830_v11 = vld [vmem:[#allocation6 + $0x28c] ss:$16 sps:$4 sm:$0xff]  }
 0x2e0   : > { %v1311_v48 = vmax.f32 %v1171_v37, 0.0  ;;  %v1315_v49 = vmax.f32 %v1257_v38, 0.0  ;;  %v4825_v37 = vld [vmem:[#allocation6 + $0x280] ss:$16 sps:$4 sm:$0xff]   ;;  %v4828_v38 = vld [vmem:[#allocation6 + $0x288] ss:$16 sps:$4 sm:$0xff]  }
 0x2e1   : > { %v1318_v50 = vmax.f32 %v1302_v39, %v1310_v9  ;;  %v5736_v51 = vmax.f32 %v1306_v43, %v1314_v44  ;;  %v4833_v43 = vld [vmem:[#allocation6 + $0x2a4] ss:$16 sps:$4 sm:$0xff]   ;;  %v4836_v9 = vld [vmem:[#allocation6 + $0x2ac] ss:$16 sps:$4 sm:$0xff]  }
 0x2e2   : > { %v1319_v53 = vmax.f32 %v1303_v45, %v1311_v48  ;;  %v5738_v54 = vmax.f32 %v1307_v47, %v1315_v49  ;;  %v4831_v47 = vld [vmem:[#allocation6 + $0x2a0] ss:$16 sps:$4 sm:$0xff]   ;;  %v4834_v48 = vld [vmem:[#allocation6 + $0x2a8] ss:$16 sps:$4 sm:$0xff]   ;;  %v4839_v49 = vld [vmem:[#allocation6 + $0x2c4] ss:$16 sps:$4 sm:$0xff]  }
 0x2e3   : > { %v1361_v55 = vrot.slane %v1318_v50, 4 }
 0x2e4   : > { %v1367_v56 = vrot.slane %v1319_v53, 4 }
 0x2e5   : > { %v1362_v57 = vmax.f32 %v1318_v50, %v1361_v55  ;;  %v4842_v50 = vld [vmem:[#allocation6 + $0x2cc] ss:$16 sps:$4 sm:$0xff]  }
 0x2e6   : > { %v1368_v58 = vmax.f32 %v1319_v53, %v1367_v56  ;;  %v4837_v56 = vld [vmem:[#allocation6 + $0x2c0] ss:$16 sps:$4 sm:$0xff]  }
 0x2e7   : > { %v1363_v59 = vrot.slane %v1362_v57, 2 }
 0x2e8   : > { %v1369_v60 = vrot.slane %v1368_v58, 2 }
 0x2e9   : > { %v1364_v61 = vmax.f32 %v1362_v57, %v1363_v59  ;;  %v4840_v57 = vld [vmem:[#allocation6 + $0x2c8] ss:$16 sps:$4 sm:$0xff]   ;;  %v4848_v59 = vld [vmem:[#allocation6 + $0x2ec] ss:$16 sps:$4 sm:$0xff]  }
 0x2ea   : > { %v1370_v62 = vmax.f32 %v1368_v58, %v1369_v60  ;;  %v4845_v58 = vld [vmem:[#allocation6 + $0x2e4] ss:$16 sps:$4 sm:$0xff]  }
 0x2eb   : > { %v1365_v63 = vrot.slane %v1364_v61, 1 }
 0x2ec   : > { %v1371_v0 = vrot.slane %v1370_v62, 1 }
 0x2ed   : > { %v1366_v2 = vmax.f32 %v1364_v61, %v1365_v63  ;;  %v4843_v61 = vld [vmem:[#allocation6 + $0x2e0] ss:$16 sps:$4 sm:$0xff]  }
 0x2ee   : > { %v1372_v3 = vmax.f32 %v1370_v62, %v1371_v0  ;;  %v4846_v62 = vld [vmem:[#allocation6 + $0x2e8] ss:$16 sps:$4 sm:$0xff]   ;;  %v4851_v0 = vld [vmem:[#allocation6 + $0x304] ss:$16 sps:$4 sm:$0xff]  }
 0x2ef   : > { %v1409_v7 = vpack.c.bf16 %v1366_v2, %v1366_v2  ;;  %v4854_v2 = vld [vmem:[#allocation6 + $0x30c] ss:$16 sps:$4 sm:$0xff]  }
 0x2f0   : > { %v1410_v4 = vpack.c.bf16 %v1372_v3, %v1372_v3 }
 0x2f2   : > { %3007 = vmatprep.mubr.bf16.mxu1 %v1410_v4  ;;  %3171 = vmatprep.mubr.bf16.mxu0 %v1410_v4 }
 0x2f3   : > { %3008 = vmatmul.mubr.bf16.vlgmr.msra.gmra.mrb[4].mxu1 %v1409_v7  ;;  %3172 = vmatmul.mubr.bf16.vlgmr.msra.gmra.mrb[16].mxu0 %v1409_v7  ;;  %v4857_v7 = vld [vmem:[#allocation6 + $0x324] ss:$16 sps:$4 sm:$0xff]  }
 0x2f4   : > { %3017 = vmatpush1.bf16.msra.mxu1 %v4801_v5  ;;  %3181 = vmatpush1.bf16.msra.mxu0 %v4804_v6  ;;  %v4849_v5 = vld [vmem:[#allocation6 + $0x300] ss:$16 sps:$4 sm:$0xff]   ;;  %v4852_v6 = vld [vmem:[#allocation6 + $0x308] ss:$16 sps:$4 sm:$0xff]  }
 0x2f5   : > { %3018 = vmatprep.subr.bf16.mxu1 %v4809_v8  ;;  %3182 = vmatprep.subr.bf16.mxu0 %v4812_v10  ;;  %v4860_v8 = vld [vmem:[#allocation6 + $0x32c] ss:$16 sps:$4 sm:$0xff]   ;;  %v796_v10 = vsub.s32 6, %v5684_v40 }
 0x2f8   : > { %3019 = vmatpush1.bf16.msra.mxu1 %v4807_v14  ;;  %3183 = vmatpush1.bf16.msra.mxu0 %v4810_v15  ;;  %v4855_v14 = vld [vmem:[#allocation6 + $0x320] ss:$16 sps:$4 sm:$0xff]   ;;  %v4858_v15 = vld [vmem:[#allocation6 + $0x328] ss:$16 sps:$4 sm:$0xff]  }
 0x2f9   : > { %3020 = vmatprep.subr.bf16.mxu1 %v4815_v16  ;;  %3184 = vmatprep.subr.bf16.mxu0 %v4818_v17  ;;  %v800_v16 = vsub.s32 7, %v5684_v40  ;;  %v4863_v17 = vld [vmem:[#allocation6 + $0x344] ss:$16 sps:$4 sm:$0xff]   ;;  %v1391_v40 = vrot.slane %v5738_v54, 4 }
 0x2fa   : > { %v1207_v24 = vpop.f32.mrb[8].mxu0 }
 0x2fb   : > { %v1208_v25 = vadd.f32 %v1207_v24, %v781_v18  ;;  %v1209_v26 = vpop.f32.mrb[9].mxu0  ;;  %v4869_v24 = vld [vmem:[#allocation6 + $0x364] ss:$16 sps:$4 sm:$0xff]  }
 0x2fc   : > { %v1210_v27 = vadd.f32 %v1209_v26, %v785_v19  ;;  %v1211_v28 = vpop.f32.mrb[10].mxu0  ;;  %3021 = vmatpush1.bf16.msra.mxu1 %v4813_v20  ;;  %3185 = vmatpush1.bf16.msra.mxu0 %v4816_v21  ;;  %v801_v20 = vrot.slane %v5727_v1, %v800_v16  ;;  %v4861_v21 = vld [vmem:[#allocation6 + $0x340] ss:$16 sps:$4 sm:$0xff]   ;;  %v4905_v16 = vld [vmem:[#allocation6 + $0x424] ss:$16 sps:$4 sm:$0xff]  }
 0x2fd   : > { %v1212_v31 = vadd.f32 %v1211_v28, %v781_v18  ;;  %v1213_v32 = vpop.f32.mrb[11].mxu0  ;;  %3022 = vmatprep.subr.bf16.mxu1 %v4821_v22  ;;  %3186 = vmatprep.subr.bf16.mxu0 %v4824_v23  ;;  %v1304_v13 = vmax.f32 %v1208_v25, 0.0  ;;  %v4866_v18 = vld [vmem:[#allocation6 + $0x34c] ss:$16 sps:$4 sm:$0xff]   ;;  %v4864_v22 = vld [vmem:[#allocation6 + $0x348] ss:$16 sps:$4 sm:$0xff]  }
 0x2fe   : > { %v1214_v12 = vadd.f32 %v1213_v32, %v785_v19  ;;  %v1305_v35 = vmax.f32 %v1210_v27, 0.0  ;;  %v797_v19 = vrot.slane %v5727_v1, %v796_v10  ;;  %v4872_v25 = vld [vmem:[#allocation6 + $0x36c] ss:$16 sps:$4 sm:$0xff]   ;;  %v4870_v32 = vld [vmem:[#allocation6 + $0x368] ss:$16 sps:$4 sm:$0xff]  }
 0x2ff   : > { %v1312_v34 = vmax.f32 %v1212_v31, 0.0  ;;  %v4867_v31 = vld [vmem:[#allocation6 + $0x360] ss:$16 sps:$4 sm:$0xff]  }
 0x300   : > { %v1313_v36 = vmax.f32 %v1214_v12, 0.0  ;;  %3023 = vmatpush1.bf16.msra.mxu1 %v4819_v29  ;;  %3187 = vmatpush1.bf16.msra.mxu0 %v4822_v30  ;;  %v4875_v12 = vld [vmem:[#allocation6 + $0x384] ss:$16 sps:$4 sm:$0xff]  }
 0x301   : > { %v5744_v39 = vmax.f32 %v1304_v13, %v1312_v34  ;;  %3024 = vmatprep.subr.bf16.mxu1 %v4827_v33  ;;  %3188 = vmatprep.subr.bf16.mxu0 %v4830_v11  ;;  %v4878_v13 = vld [vmem:[#allocation6 + $0x38c] ss:$16 sps:$4 sm:$0xff]   ;;  %v1392_v34 = vmax.f32 %v5738_v54, %v1391_v40  ;;  %v4879_v54 = vld [vmem:[#allocation6 + $0x3a0] ss:$16 sps:$4 sm:$0xff]  }
 0x302   : > { %v1321_v44 = vmax.f32 %v1305_v35, %v1313_v36  ;;  %v4915_v40 = vld [vmem:[#allocation6 + $0x460] ss:$16 sps:$4 sm:$0xff]  }
 0x303   : > { %v1373_v23 = vrot.slane %v5744_v39, 4 }
 0x304   : > { %v1379_v45 = vrot.slane %v1321_v44, 4  ;;  %3025 = vmatpush1.bf16.msra.mxu1 %v4825_v37  ;;  %3189 = vmatpush1.bf16.msra.mxu0 %v4828_v38 }
 0x305   : > { %3026 = vmatprep.subr.bf16.mxu1 %v4833_v43  ;;  %3190 = vmatprep.subr.bf16.mxu0 %v4836_v9  ;;  %v1374_v1 = vmax.f32 %v5744_v39, %v1373_v23  ;;  %v4873_v9 = vld [vmem:[#allocation6 + $0x380] ss:$16 sps:$4 sm:$0xff]   ;;  %v4881_v39 = vld [vmem:[#allocation6 + $0x3a4] ss:$16 sps:$4 sm:$0xff]   ;;  %v4912_v23 = vld [vmem:[#allocation6 + $0x448] ss:$16 sps:$4 sm:$0xff]  }
 0x306   : > { %v1380_v53 = vmax.f32 %v1321_v44, %v1379_v45  ;;  %v4876_v44 = vld [vmem:[#allocation6 + $0x388] ss:$16 sps:$4 sm:$0xff]  }
 0x307   : > { %v1375_v45 = vrot.slane %v1374_v1, 2 }
 0x308   : > { %v1381_v55 = vrot.slane %v1380_v53, 2  ;;  %3027 = vmatpush1.bf16.msra.mxu1 %v4831_v47  ;;  %3191 = vmatpush1.bf16.msra.mxu0 %v4834_v48  ;;  %v4884_v48 = vld [vmem:[#allocation6 + $0x3ac] ss:$16 sps:$4 sm:$0xff]  }
 0x309   : > { %3028 = vmatprep.subr.bf16.mxu1 %v4839_v49  ;;  %3192 = vmatprep.subr.bf16.mxu0 %v4842_v50  ;;  %v1393_v49 = vrot.slane %v1392_v34, 2 }
 0x30a   : > { %v1382_v60 = vmax.f32 %v1380_v53, %v1381_v55  ;;  %v4882_v53 = vld [vmem:[#allocation6 + $0x3a8] ss:$16 sps:$4 sm:$0xff]   ;;  %v1376_v55 = vmax.f32 %v1374_v1, %v1375_v45  ;;  %v4927_v1 = vld [vmem:[#allocation6 + $0x4a0] ss:$16 sps:$4 sm:$0xff]  }
 0x30b   : > { %v4948_v45 = vld [vmem:[#allocation6 + $0x508] ss:$16 sps:$4 sm:$0xff]  }
 0x30c   : > { %3029 = vmatpush1.bf16.msra.mxu1 %v4837_v56  ;;  %3193 = vmatpush1.bf16.msra.mxu0 %v4840_v57  ;;  %v1383_v63 = vrot.slane %v1382_v60, 1  ;;  %v4887_v56 = vld [vmem:[#allocation6 + $0x3c4] ss:$16 sps:$4 sm:$0xff]   ;;  %v4890_v57 = vld [vmem:[#allocation6 + $0x3cc] ss:$16 sps:$4 sm:$0xff]  }
 0x30d   : > { %3030 = vmatprep.subr.bf16.mxu1 %v4845_v58  ;;  %3194 = vmatprep.subr.bf16.mxu0 %v4848_v59  ;;  %v1394_v58 = vmax.f32 %v1392_v34, %v1393_v49  ;;  %v4885_v59 = vld [vmem:[#allocation6 + $0x3c0] ss:$16 sps:$4 sm:$0xff]   ;;  %v4936_v34 = vld [vmem:[#allocation6 + $0x4c8] ss:$16 sps:$4 sm:$0xff]  }
 0x30e   : > { %v1384_v3 = vmax.f32 %v1382_v60, %v1383_v63  ;;  %v4888_v60 = vld [vmem:[#allocation6 + $0x3c8] ss:$16 sps:$4 sm:$0xff]   ;;  %v4896_v63 = vld [vmem:[#allocation6 + $0x3ec] ss:$16 sps:$4 sm:$0xff]   ;;  %v4951_v49 = vld [vmem:[#allocation6 + $0x520] ss:$16 sps:$4 sm:$0xff]  }
 0x310   : > { %3031 = vmatpush1.bf16.msra.mxu1 %v4843_v61  ;;  %3195 = vmatpush1.bf16.msra.mxu0 %v4846_v62  ;;  %v1412_v4 = vpack.c.bf16 %v1384_v3, %v1384_v3  ;;  %v1377_v61 = vrot.slane %v1376_v55, 1  ;;  %v4893_v62 = vld [vmem:[#allocation6 + $0x3e4] ss:$16 sps:$4 sm:$0xff]   ;;  %v4894_v3 = vld [vmem:[#allocation6 + $0x3e8] ss:$16 sps:$4 sm:$0xff]  }
 0x311   : > { %3032 = vmatprep.subr.bf16.mxu1 %v4851_v0  ;;  %3196 = vmatprep.subr.bf16.mxu0 %v4854_v2  ;;  %v1395_v0 = vrot.slane %v1394_v58, 1  ;;  %v4891_v2 = vld [vmem:[#allocation6 + $0x3e0] ss:$16 sps:$4 sm:$0xff]  }
 0x312   : > { %3048 = vmatprep.mubr.bf16.mxu1 %v1412_v4  ;;  %3212 = vmatprep.mubr.bf16.mxu0 %v1412_v4  ;;  %v1378_v4 = vmax.f32 %v1376_v55, %v1377_v61  ;;  %v4962_v55 = vld [vmem:[#allocation6 + $0x54c] ss:$16 sps:$4 sm:$0xff]  }
 0x314   : > { %3033 = vmatpush1.bf16.msra.mxu1 %v4849_v5  ;;  %3197 = vmatpush1.bf16.msra.mxu0 %v4852_v6  ;;  %v4899_v5 = vld [vmem:[#allocation6 + $0x404] ss:$16 sps:$4 sm:$0xff]   ;;  %v4902_v6 = vld [vmem:[#allocation6 + $0x40c] ss:$16 sps:$4 sm:$0xff]   ;;  %v1411_v10 = vpack.c.bf16 %v1378_v4, %v1378_v4 }
 0x315   : > { %3034 = vmatprep.subr.bf16.mxu1 %v4857_v7  ;;  %3198 = vmatprep.subr.bf16.mxu0 %v4860_v8  ;;  %v1396_v7 = vmax.f32 %v1394_v58, %v1395_v0  ;;  %v4897_v8 = vld [vmem:[#allocation6 + $0x400] ss:$16 sps:$4 sm:$0xff]   ;;  %v4960_v58 = vld [vmem:[#allocation6 + $0x548] ss:$16 sps:$4 sm:$0xff]  }
 0x316   : > { %v4966_v0 = vld [vmem:[#allocation6 + $0x568] ss:$16 sps:$4 sm:$0xff]  }
 0x318   : > { %3035 = vmatpush1.bf16.msra.mxu1 %v4855_v14  ;;  %3199 = vmatpush1.bf16.msra.mxu0 %v4858_v15  ;;  %v4900_v14 = vld [vmem:[#allocation6 + $0x408] ss:$16 sps:$4 sm:$0xff]   ;;  %v1414_v15 = vpack.c.bf16 %v1396_v7, %v1396_v7 }
 0x319   : > { %3036 = vmatprep.subr.bf16.mxu1 %v4863_v17  ;;  %3200 = vmatprep.subr.bf16.mxu0 %v4866_v18  ;;  %v4908_v17 = vld [vmem:[#allocation6 + $0x42c] ss:$16 sps:$4 sm:$0xff]   ;;  %v4903_v18 = vld [vmem:[#allocation6 + $0x420] ss:$16 sps:$4 sm:$0xff]   ;;  %v4972_v7 = vld [vmem:[#allocation6 + $0x588] ss:$16 sps:$4 sm:$0xff]  }
 0x31a   : > { %v1293_v26 = vpop.f32.mrb[12].mxu0 }
 0x31b   : > { %v1294_v27 = vadd.f32 %v1293_v26, %v797_v19  ;;  %v1295_v28 = vpop.f32.mrb[13].mxu0  ;;  %v4918_v26 = vld [vmem:[#allocation6 + $0x468] ss:$16 sps:$4 sm:$0xff]  }
 0x31c   : > { %v1296_v29 = vadd.f32 %v1295_v28, %v801_v20  ;;  %v1297_v30 = vpop.f32.mrb[14].mxu0  ;;  %3037 = vmatpush1.bf16.msra.mxu1 %v4861_v21  ;;  %3201 = vmatpush1.bf16.msra.mxu0 %v4864_v22  ;;  %v4914_v21 = vld [vmem:[#allocation6 + $0x44c] ss:$16 sps:$4 sm:$0xff]   ;;  %v4909_v22 = vld [vmem:[#allocation6 + $0x440] ss:$16 sps:$4 sm:$0xff]  }
 0x31d   : > { %v1298_v33 = vadd.f32 %v1297_v30, %v797_v19  ;;  %v1299_v11 = vpop.f32.mrb[15].mxu0  ;;  %3038 = vmatprep.subr.bf16.mxu1 %v4869_v24  ;;  %3202 = vmatprep.subr.bf16.mxu0 %v4872_v25  ;;  %v1308_v36 = vmax.f32 %v1294_v27, 0.0  ;;  %v4906_v19 = vld [vmem:[#allocation6 + $0x428] ss:$16 sps:$4 sm:$0xff]   ;;  %v4917_v24 = vld [vmem:[#allocation6 + $0x464] ss:$16 sps:$4 sm:$0xff]  }
 0x31e   : > { %v1300_v35 = vadd.f32 %v1299_v11, %v801_v20  ;;  %v1309_v38 = vmax.f32 %v1296_v29, 0.0  ;;  %v4911_v20 = vld [vmem:[#allocation6 + $0x444] ss:$16 sps:$4 sm:$0xff]   ;;  %v4920_v25 = vld [vmem:[#allocation6 + $0x46c] ss:$16 sps:$4 sm:$0xff]  }
 0x31f   : > { %v1316_v37 = vmax.f32 %v1298_v33, 0.0  ;;  %v4923_v27 = vld [vmem:[#allocation6 + $0x484] ss:$16 sps:$4 sm:$0xff]   ;;  %v4926_v28 = vld [vmem:[#allocation6 + $0x48c] ss:$16 sps:$4 sm:$0xff]  }
 0x320   : > { %v1317_v43 = vmax.f32 %v1300_v35, 0.0  ;;  %3039 = vmatpush1.bf16.msra.mxu1 %v4867_v31  ;;  %3203 = vmatpush1.bf16.msra.mxu0 %v4870_v32  ;;  %v4921_v29 = vld [vmem:[#allocation6 + $0x480] ss:$16 sps:$4 sm:$0xff]   ;;  %v4924_v30 = vld [vmem:[#allocation6 + $0x488] ss:$16 sps:$4 sm:$0xff]  }
 0x321   : > { %v5754_v47 = vmax.f32 %v1308_v36, %v1316_v37  ;;  %3040 = vmatprep.subr.bf16.mxu1 %v4875_v12  ;;  %3204 = vmatprep.subr.bf16.mxu0 %v4878_v13  ;;  %v4929_v31 = vld [vmem:[#allocation6 + $0x4a4] ss:$16 sps:$4 sm:$0xff]   ;;  %v4932_v32 = vld [vmem:[#allocation6 + $0x4ac] ss:$16 sps:$4 sm:$0xff]   ;;  %v4930_v33 = vld [vmem:[#allocation6 + $0x4a8] ss:$16 sps:$4 sm:$0xff]  }
 0x322   : > { %v5756_v50 = vmax.f32 %v1309_v38, %v1317_v43  ;;  %v4935_v11 = vld [vmem:[#allocation6 + $0x4c4] ss:$16 sps:$4 sm:$0xff]   ;;  %v4938_v12 = vld [vmem:[#allocation6 + $0x4cc] ss:$16 sps:$4 sm:$0xff]   ;;  %v4933_v13 = vld [vmem:[#allocation6 + $0x4c0] ss:$16 sps:$4 sm:$0xff]  }
 0x323   : > { %v4941_v35 = vld [vmem:[#allocation6 + $0x4e4] ss:$16 sps:$4 sm:$0xff]   ;;  %v4944_v36 = vld [vmem:[#allocation6 + $0x4ec] ss:$16 sps:$4 sm:$0xff]   ;;  %v4939_v37 = vld [vmem:[#allocation6 + $0x4e0] ss:$16 sps:$4 sm:$0xff]  }
 0x324   : > { %3041 = vmatpush1.bf16.msra.mxu1 %v4873_v9  ;;  %3205 = vmatpush1.bf16.msra.mxu0 %v4876_v44  ;;  %v4942_v38 = vld [vmem:[#allocation6 + $0x4e8] ss:$16 sps:$4 sm:$0xff]   ;;  %v4947_v43 = vld [vmem:[#allocation6 + $0x504] ss:$16 sps:$4 sm:$0xff]   ;;  %v4950_v9 = vld [vmem:[#allocation6 + $0x50c] ss:$16 sps:$4 sm:$0xff]  }
 0x325   : > { %3042 = vmatprep.subr.bf16.mxu1 %v4881_v39  ;;  %3206 = vmatprep.subr.bf16.mxu0 %v4884_v48  ;;  %v4945_v44 = vld [vmem:[#allocation6 + $0x500] ss:$16 sps:$4 sm:$0xff]   ;;  %v4953_v39 = vld [vmem:[#allocation6 + $0x524] ss:$16 sps:$4 sm:$0xff]   ;;  %v4956_v48 = vld [vmem:[#allocation6 + $0x52c] ss:$16 sps:$4 sm:$0xff]  }
 0x326   : > { %v1403_v61 = vrot.slane %v5756_v50, 4 }
 0x328   : > { %3043 = vmatpush1.bf16.msra.mxu1 %v4879_v54  ;;  %3207 = vmatpush1.bf16.msra.mxu0 %v4882_v53  ;;  %v4954_v54 = vld [vmem:[#allocation6 + $0x528] ss:$16 sps:$4 sm:$0xff]   ;;  %v4959_v53 = vld [vmem:[#allocation6 + $0x544] ss:$16 sps:$4 sm:$0xff]   ;;  %v1404_v4 = vmax.f32 %v5756_v50, %v1403_v61 }
 0x329   : > { %3044 = vmatprep.subr.bf16.mxu1 %v4887_v56  ;;  %3208 = vmatprep.subr.bf16.mxu0 %v4890_v57  ;;  %v4957_v56 = vld [vmem:[#allocation6 + $0x540] ss:$16 sps:$4 sm:$0xff]   ;;  %v1385_v57 = vrot.slane %v5736_v51, 4  ;;  %v5037_v61 = vld [vmem:[#allocation6 + $0x6e4] ss:$16 sps:$4 sm:$0xff]  }
 0x32c   : > { %3045 = vmatpush1.bf16.msra.mxu1 %v4885_v59  ;;  %3209 = vmatpush1.bf16.msra.mxu0 %v4888_v60  ;;  %v4965_v59 = vld [vmem:[#allocation6 + $0x564] ss:$16 sps:$4 sm:$0xff]   ;;  %v4968_v60 = vld [vmem:[#allocation6 + $0x56c] ss:$16 sps:$4 sm:$0xff]  }
 0x32d   : > { %3046 = vmatprep.subr.bf16.mxu1 %v4893_v62  ;;  %3210 = vmatprep.subr.bf16.mxu0 %v4896_v63  ;;  %v4963_v62 = vld [vmem:[#allocation6 + $0x560] ss:$16 sps:$4 sm:$0xff]   ;;  %v1386_v63 = vmax.f32 %v5736_v51, %v1385_v57  ;;  %v5031_v57 = vld [vmem:[#allocation6 + $0x6c4] ss:$16 sps:$4 sm:$0xff]  }
 0x32e   : > { %v4975_v51 = vld [vmem:[#allocation6 + $0x5a0] ss:$16 sps:$4 sm:$0xff]  }
 0x330   : > { %3047 = vmatpush1.bf16.msra.mxu1 %v4891_v2  ;;  %3211 = vmatpush1.bf16.msra.mxu0 %v4894_v3  ;;  %v4971_v2 = vld [vmem:[#allocation6 + $0x584] ss:$16 sps:$4 sm:$0xff]   ;;  %v4974_v3 = vld [vmem:[#allocation6 + $0x58c] ss:$16 sps:$4 sm:$0xff]  }
 0x331   : > { %3057 = vmatprep.subr.bf16.mxu1 %v4899_v5  ;;  %3221 = vmatprep.subr.bf16.mxu0 %v4902_v6  ;;  %v4969_v5 = vld [vmem:[#allocation6 + $0x580] ss:$16 sps:$4 sm:$0xff]   ;;  %v1387_v6 = vrot.slane %v1386_v63, 2 }
 0x333   : > { %3049 = vmatmul.mubr.bf16.vlgmr.msra.gmra.mrb[4].mxu1 %v1411_v10  ;;  %3213 = vmatmul.mubr.bf16.vlgmr.msra.gmra.mrb[16].mxu0 %v1411_v10  ;;  %v4980_v10 = vld [vmem:[#allocation6 + $0x5ac] ss:$16 sps:$4 sm:$0xff]  }
 0x334   : > { %3058 = vmatpush1.bf16.msra.mxu1 %v4897_v8  ;;  %3089 = vmatprep.mubr.bf16.mxu1 %v1414_v15  ;;  %v4977_v8 = vld [vmem:[#allocation6 + $0x5a4] ss:$16 sps:$4 sm:$0xff]  }
 0x335   : > { %3222 = vmatpush1.bf16.msra.mxu0 %v4900_v14  ;;  %3253 = vmatprep.mubr.bf16.mxu0 %v1414_v15  ;;  %v1405_v14 = vrot.slane %v1404_v4, 2  ;;  %v1388_v15 = vmax.f32 %v1386_v63, %v1387_v6  ;;  %v5035_v63 = vld [vmem:[#allocation6 + $0x6e0] ss:$16 sps:$4 sm:$0xff]   ;;  %v5049_v6 = vld [vmem:[#allocation6 + $0x724] ss:$16 sps:$4 sm:$0xff]  }
 0x336   : > { %3059 = vmatprep.subr.bf16.mxu1 %v4905_v16  ;;  %3223 = vmatprep.subr.bf16.mxu0 %v4908_v17  ;;  %v4978_v16 = vld [vmem:[#allocation6 + $0x5a8] ss:$16 sps:$4 sm:$0xff]   ;;  %v4983_v17 = vld [vmem:[#allocation6 + $0x5c4] ss:$16 sps:$4 sm:$0xff]  }
 0x337   : > { %v1406_v50 = vmax.f32 %v1404_v4, %v1405_v14  ;;  %v5041_v4 = vld [vmem:[#allocation6 + $0x700] ss:$16 sps:$4 sm:$0xff]   ;;  %v5055_v14 = vld [vmem:[#allocation6 + $0x744] ss:$16 sps:$4 sm:$0xff]  }
 0x338   : > { %3060 = vmatpush1.bf16.msra.mxu1 %v4903_v18  ;;  %v4986_v18 = vld [vmem:[#allocation6 + $0x5cc] ss:$16 sps:$4 sm:$0xff]  }
 0x339   : > { %3224 = vmatpush1.bf16.msra.mxu0 %v4906_v19  ;;  %3061 = vmatprep.subr.bf16.mxu1 %v4911_v20  ;;  %v4981_v19 = vld [vmem:[#allocation6 + $0x5c0] ss:$16 sps:$4 sm:$0xff]   ;;  %v1389_v20 = vrot.slane %v1388_v15, 1 }
 0x33a   : > { %3225 = vmatprep.subr.bf16.mxu0 %v4914_v21  ;;  %v4984_v21 = vld [vmem:[#allocation6 + $0x5c8] ss:$16 sps:$4 sm:$0xff]  }
 0x33c   : > { %3062 = vmatpush1.bf16.msra.mxu1 %v4909_v22  ;;  %v4989_v22 = vld [vmem:[#allocation6 + $0x5e4] ss:$16 sps:$4 sm:$0xff]  }
 0x33d   : > { %3226 = vmatpush1.bf16.msra.mxu0 %v4912_v23  ;;  %3063 = vmatprep.subr.bf16.mxu1 %v4917_v24  ;;  %v4992_v23 = vld [vmem:[#allocation6 + $0x5ec] ss:$16 sps:$4 sm:$0xff]   ;;  %v1407_v24 = vrot.slane %v1406_v50, 1 }
 0x33e   : > { %3227 = vmatprep.subr.bf16.mxu0 %v4920_v25  ;;  %v4987_v25 = vld [vmem:[#allocation6 + $0x5e0] ss:$16 sps:$4 sm:$0xff]  }
 0x340   : > { %3064 = vmatpush1.bf16.msra.mxu1 %v4915_v40  ;;  %v4990_v40 = vld [vmem:[#allocation6 + $0x5e8] ss:$16 sps:$4 sm:$0xff]  }
 0x341   : > { %3228 = vmatpush1.bf16.msra.mxu0 %v4918_v26  ;;  %3065 = vmatprep.subr.bf16.mxu1 %v4923_v27  ;;  %v1390_v26 = vmax.f32 %v1388_v15, %v1389_v20  ;;  %v4995_v27 = vld [vmem:[#allocation6 + $0x604] ss:$16 sps:$4 sm:$0xff]   ;;  %v5053_v15 = vld [vmem:[#allocation6 + $0x740] ss:$16 sps:$4 sm:$0xff]  }
 0x342   : > { %3229 = vmatprep.subr.bf16.mxu0 %v4926_v28  ;;  %v4998_v28 = vld [vmem:[#allocation6 + $0x60c] ss:$16 sps:$4 sm:$0xff]  }
 0x344   : > { %3066 = vmatpush1.bf16.msra.mxu1 %v4921_v29  ;;  %v1408_v29 = vmax.f32 %v1406_v50, %v1407_v24  ;;  %v5064_v50 = vld [vmem:[#allocation6 + $0x76c] ss:$16 sps:$4 sm:$0xff]   ;;  %v5065_v24 = vld [vmem:[#allocation6 + $0x780] ss:$16 sps:$4 sm:$0xff]  }
 0x345   : > { %3230 = vmatpush1.bf16.msra.mxu0 %v4924_v30  ;;  %3067 = vmatprep.subr.bf16.mxu1 %v4929_v31  ;;  %v4993_v30 = vld [vmem:[#allocation6 + $0x600] ss:$16 sps:$4 sm:$0xff]   ;;  %v1413_v31 = vpack.c.bf16 %v1390_v26, %v1390_v26  ;;  %v5073_v26 = vld [vmem:[#allocation6 + $0x7a4] ss:$16 sps:$4 sm:$0xff]  }
 0x346   : > { %3231 = vmatprep.subr.bf16.mxu0 %v4932_v32  ;;  %v4996_v32 = vld [vmem:[#allocation6 + $0x608] ss:$16 sps:$4 sm:$0xff]  }
 0x348   : > { %3068 = vmatpush1.bf16.msra.mxu1 %v4927_v1  ;;  %v5001_v1 = vld [vmem:[#allocation6 + $0x624] ss:$16 sps:$4 sm:$0xff]  }
 0x349   : > { %3232 = vmatpush1.bf16.msra.mxu0 %v4930_v33  ;;  %3069 = vmatprep.subr.bf16.mxu1 %v4935_v11  ;;  %v1416_v33 = vpack.c.bf16 %v1408_v29, %v1408_v29  ;;  %v5004_v11 = vld [vmem:[#allocation6 + $0x62c] ss:$16 sps:$4 sm:$0xff]  }
 0x34a   : > { %3233 = vmatprep.subr.bf16.mxu0 %v4938_v12  ;;  %v4999_v12 = vld [vmem:[#allocation6 + $0x620] ss:$16 sps:$4 sm:$0xff]  }
 0x34c   : > { %3070 = vmatpush1.bf16.msra.mxu1 %v4933_v13  ;;  %v5002_v13 = vld [vmem:[#allocation6 + $0x628] ss:$16 sps:$4 sm:$0xff]  }
 0x34d   : > { %3234 = vmatpush1.bf16.msra.mxu0 %v4936_v34  ;;  %3071 = vmatprep.subr.bf16.mxu1 %v4941_v35  ;;  %v5007_v34 = vld [vmem:[#allocation6 + $0x644] ss:$16 sps:$4 sm:$0xff]   ;;  %v5010_v35 = vld [vmem:[#allocation6 + $0x64c] ss:$16 sps:$4 sm:$0xff]  }
 0x34e   : > { %3235 = vmatprep.subr.bf16.mxu0 %v4944_v36  ;;  %v5005_v36 = vld [vmem:[#allocation6 + $0x640] ss:$16 sps:$4 sm:$0xff]  }
 0x350   : > { %3072 = vmatpush1.bf16.msra.mxu1 %v4939_v37  ;;  %v5008_v37 = vld [vmem:[#allocation6 + $0x648] ss:$16 sps:$4 sm:$0xff]  }
 0x351   : > { %3236 = vmatpush1.bf16.msra.mxu0 %v4942_v38  ;;  %3073 = vmatprep.subr.bf16.mxu1 %v4947_v43  ;;  %v5013_v38 = vld [vmem:[#allocation6 + $0x664] ss:$16 sps:$4 sm:$0xff]   ;;  %v5016_v43 = vld [vmem:[#allocation6 + $0x66c] ss:$16 sps:$4 sm:$0xff]  }
 0x352   : > { %3237 = vmatprep.subr.bf16.mxu0 %v4950_v9  ;;  %v5011_v9 = vld [vmem:[#allocation6 + $0x660] ss:$16 sps:$4 sm:$0xff]  }
 0x354   : > { %3074 = vmatpush1.bf16.msra.mxu1 %v4945_v44  ;;  %v5014_v44 = vld [vmem:[#allocation6 + $0x668] ss:$16 sps:$4 sm:$0xff]  }
 0x355   : > { %3238 = vmatpush1.bf16.msra.mxu0 %v4948_v45  ;;  %3075 = vmatprep.subr.bf16.mxu1 %v4953_v39  ;;  %v5019_v45 = vld [vmem:[#allocation6 + $0x684] ss:$16 sps:$4 sm:$0xff]   ;;  %v5022_v39 = vld [vmem:[#allocation6 + $0x68c] ss:$16 sps:$4 sm:$0xff]  }
 0x356   : > { %3239 = vmatprep.subr.bf16.mxu0 %v4956_v48  ;;  %v5017_v48 = vld [vmem:[#allocation6 + $0x680] ss:$16 sps:$4 sm:$0xff]  }
 0x358   : > { %3076 = vmatpush1.bf16.msra.mxu1 %v4951_v49  ;;  %v5020_v49 = vld [vmem:[#allocation6 + $0x688] ss:$16 sps:$4 sm:$0xff]  }
 0x359   : > { %3240 = vmatpush1.bf16.msra.mxu0 %v4954_v54  ;;  %3077 = vmatprep.subr.bf16.mxu1 %v4959_v53  ;;  %v5025_v54 = vld [vmem:[#allocation6 + $0x6a4] ss:$16 sps:$4 sm:$0xff]   ;;  %v5028_v53 = vld [vmem:[#allocation6 + $0x6ac] ss:$16 sps:$4 sm:$0xff]  }
 0x35a   : > { %3241 = vmatprep.subr.bf16.mxu0 %v4962_v55  ;;  %v5023_v55 = vld [vmem:[#allocation6 + $0x6a0] ss:$16 sps:$4 sm:$0xff]  }
 0x35c   : > { %3078 = vmatpush1.bf16.msra.mxu1 %v4957_v56  ;;  %v5026_v56 = vld [vmem:[#allocation6 + $0x6a8] ss:$16 sps:$4 sm:$0xff]  }
 0x35d   : > { %3242 = vmatpush1.bf16.msra.mxu0 %v4960_v58  ;;  %3079 = vmatprep.subr.bf16.mxu1 %v4965_v59  ;;  %v5034_v58 = vld [vmem:[#allocation6 + $0x6cc] ss:$16 sps:$4 sm:$0xff]   ;;  %v5029_v59 = vld [vmem:[#allocation6 + $0x6c0] ss:$16 sps:$4 sm:$0xff]  }
 0x35e   : > { %3243 = vmatprep.subr.bf16.mxu0 %v4968_v60  ;;  %v5032_v60 = vld [vmem:[#allocation6 + $0x6c8] ss:$16 sps:$4 sm:$0xff]  }
 0x360   : > { %3080 = vmatpush1.bf16.msra.mxu1 %v4963_v62  ;;  %v5040_v62 = vld [vmem:[#allocation6 + $0x6ec] ss:$16 sps:$4 sm:$0xff]  }
 0x361   : > { %3244 = vmatpush1.bf16.msra.mxu0 %v4966_v0  ;;  %3081 = vmatprep.subr.bf16.mxu1 %v4971_v2  ;;  %v5038_v0 = vld [vmem:[#allocation6 + $0x6e8] ss:$16 sps:$4 sm:$0xff]   ;;  %v5043_v2 = vld [vmem:[#allocation6 + $0x704] ss:$16 sps:$4 sm:$0xff]  }
 0x362   : > { %3245 = vmatprep.subr.bf16.mxu0 %v4974_v3  ;;  %v5046_v3 = vld [vmem:[#allocation6 + $0x70c] ss:$16 sps:$4 sm:$0xff]  }
 0x364   : > { %3082 = vmatpush1.bf16.msra.mxu1 %v4969_v5  ;;  %v5044_v5 = vld [vmem:[#allocation6 + $0x708] ss:$16 sps:$4 sm:$0xff]  }
 0x365   : > { %3246 = vmatpush1.bf16.msra.mxu0 %v4972_v7  ;;  %3083 = vmatprep.subr.bf16.mxu1 %v4977_v8  ;;  %v5052_v7 = vld [vmem:[#allocation6 + $0x72c] ss:$16 sps:$4 sm:$0xff]   ;;  %v5047_v8 = vld [vmem:[#allocation6 + $0x720] ss:$16 sps:$4 sm:$0xff]  }
 0x366   : > { %3247 = vmatprep.subr.bf16.mxu0 %v4980_v10  ;;  %v5050_v10 = vld [vmem:[#allocation6 + $0x728] ss:$16 sps:$4 sm:$0xff]  }
 0x368   : > { %3084 = vmatpush1.bf16.msra.mxu1 %v4975_v51  ;;  %v5058_v51 = vld [vmem:[#allocation6 + $0x74c] ss:$16 sps:$4 sm:$0xff]  }
 0x369   : > { %3248 = vmatpush1.bf16.msra.mxu0 %v4978_v16  ;;  %3085 = vmatprep.subr.bf16.mxu1 %v4983_v17  ;;  %v1397_v16 = vrot.slane %v5754_v47, 4  ;;  %v5056_v17 = vld [vmem:[#allocation6 + $0x748] ss:$16 sps:$4 sm:$0xff]  }
 0x36a   : > { %3249 = vmatprep.subr.bf16.mxu0 %v4986_v18  ;;  %v5061_v18 = vld [vmem:[#allocation6 + $0x764] ss:$16 sps:$4 sm:$0xff]  }
 0x36b   : > { %v1398_v20 = vmax.f32 %v5754_v47, %v1397_v16  ;;  %v5074_v47 = vld [vmem:[#allocation6 + $0x7a8] ss:$16 sps:$4 sm:$0xff]   ;;  %v5139_v16 = vld [vmem:[#allocation8 + $0x104] ss:$8 sps:$4 sm:$0xff]  }
 0x36c   : > { %3086 = vmatpush1.bf16.msra.mxu1 %v4981_v19  ;;  %v5059_v19 = vld [vmem:[#allocation6 + $0x760] ss:$16 sps:$4 sm:$0xff]  }
 0x36d   : > { %3250 = vmatpush1.bf16.msra.mxu0 %v4984_v21  ;;  %3087 = vmatprep.subr.bf16.mxu1 %v4989_v22  ;;  %v5062_v21 = vld [vmem:[#allocation6 + $0x768] ss:$16 sps:$4 sm:$0xff]   ;;  %v5067_v22 = vld [vmem:[#allocation6 + $0x784] ss:$16 sps:$4 sm:$0xff]  }
 0x36e   : > { %3251 = vmatprep.subr.bf16.mxu0 %v4992_v23  ;;  %v5070_v23 = vld [vmem:[#allocation6 + $0x78c] ss:$16 sps:$4 sm:$0xff]  }
 0x370   : > { %3088 = vmatpush1.bf16.msra.mxu1 %v4987_v25  ;;  %v1399_v25 = vrot.slane %v1398_v20, 2 }
 0x371   : > { %3252 = vmatpush1.bf16.msra.mxu0 %v4990_v40  ;;  %3098 = vmatprep.subr.bf16.mxu1 %v4995_v27  ;;  %v5068_v40 = vld [vmem:[#allocation6 + $0x788] ss:$16 sps:$4 sm:$0xff]   ;;  %v5076_v27 = vld [vmem:[#allocation6 + $0x7ac] ss:$16 sps:$4 sm:$0xff]  }
 0x372   : > { %3262 = vmatprep.subr.bf16.mxu0 %v4998_v28  ;;  %v5071_v28 = vld [vmem:[#allocation6 + $0x7a0] ss:$16 sps:$4 sm:$0xff]   ;;  %v1400_v29 = vmax.f32 %v1398_v20, %v1399_v25 }
 0x373   : > { %3090 = vmatmul.mubr.bf16.vlgmr.msra.gmra.mrb[4].mxu1 %v1413_v31  ;;  %v5189_v20 = vld [vmem:[#allocation9 + $0x50] sm:$0xff]   ;;  %v5194_v25 = vld [vmem:[#allocation9 + $0x20] sm:$0xff]  }
 0x374   : > { %3254 = vmatmul.mubr.bf16.vlgmr.msra.gmra.mrb[16].mxu0 %v1413_v31  ;;  %3099 = vmatpush1.bf16.msra.mxu1 %v4993_v30  ;;  %v5079_v30 = vld [vmem:[#allocation6 + $0x7c4] ss:$16 sps:$4 sm:$0xff]   ;;  %v5082_v31 = vld [vmem:[#allocation6 + $0x7cc] ss:$16 sps:$4 sm:$0xff]  }
 0x375   : > { %3130 = vmatprep.mubr.bf16.mxu1 %v1416_v33  ;;  %3263 = vmatpush1.bf16.msra.mxu0 %v4996_v32  ;;  %v5077_v32 = vld [vmem:[#allocation6 + $0x7c0] ss:$16 sps:$4 sm:$0xff]  }
 0x376   : > { %3294 = vmatprep.mubr.bf16.mxu0 %v1416_v33  ;;  %3100 = vmatprep.subr.bf16.mxu1 %v5001_v1  ;;  %v1401_v1 = vrot.slane %v1400_v29, 1  ;;  %v5080_v33 = vld [vmem:[#allocation6 + $0x7c8] ss:$16 sps:$4 sm:$0xff]  }
 0x377   : > { %3264 = vmatprep.subr.bf16.mxu0 %v5004_v11  ;;  %v5085_v11 = vld [vmem:[#allocation6 + $0x7e4] ss:$16 sps:$4 sm:$0xff]  }
 0x378   : > { %3101 = vmatpush1.bf16.msra.mxu1 %v4999_v12  ;;  %v5088_v12 = vld [vmem:[#allocation6 + $0x7ec] ss:$16 sps:$4 sm:$0xff]  }
 0x379   : > { %3265 = vmatpush1.bf16.msra.mxu0 %v5002_v13  ;;  %3102 = vmatprep.subr.bf16.mxu1 %v5007_v34  ;;  %v5083_v13 = vld [vmem:[#allocation6 + $0x7e0] ss:$16 sps:$4 sm:$0xff]   ;;  %v5086_v34 = vld [vmem:[#allocation6 + $0x7e8] ss:$16 sps:$4 sm:$0xff]  }
 0x37a   : > { %3266 = vmatprep.subr.bf16.mxu0 %v5010_v35  ;;  %v1402_v35 = vmax.f32 %v1400_v29, %v1401_v1 }
 0x37c   : > { %3103 = vmatpush1.bf16.msra.mxu1 %v5005_v36  ;;  %v5091_v36 = vld [vmem:[#allocation8 + $0x4] ss:$8 sps:$4 sm:$0xff]  }
 0x37d   : > { %3267 = vmatpush1.bf16.msra.mxu0 %v5008_v37  ;;  %3104 = vmatprep.subr.bf16.mxu1 %v5013_v38  ;;  %v5089_v37 = vld [vmem:[#allocation8] ss:$8 sps:$4 sm:$0xff]   ;;  %v1415_v38 = vpack.c.bf16 %v1402_v35, %v1402_v35 }
 0x37e   : > { %3268 = vmatprep.subr.bf16.mxu0 %v5016_v43  ;;  %v5094_v43 = vld [vmem:[#allocation8 + $0x14] ss:$8 sps:$4 sm:$0xff]  }
 0x380   : > { %3105 = vmatpush1.bf16.msra.mxu1 %v5011_v9  ;;  %v5092_v9 = vld [vmem:[#allocation8 + $0x10] ss:$8 sps:$4 sm:$0xff]  }
 0x381   : > { %3269 = vmatpush1.bf16.msra.mxu0 %v5014_v44  ;;  %3106 = vmatprep.subr.bf16.mxu1 %v5019_v45  ;;  %v5097_v44 = vld [vmem:[#allocation8 + $0x24] ss:$8 sps:$4 sm:$0xff]   ;;  %v5095_v45 = vld [vmem:[#allocation8 + $0x20] ss:$8 sps:$4 sm:$0xff]  }
 0x382   : > { %3270 = vmatprep.subr.bf16.mxu0 %v5022_v39  ;;  %v5100_v39 = vld [vmem:[#allocation8 + $0x34] ss:$8 sps:$4 sm:$0xff]  }
 0x384   : > { %3107 = vmatpush1.bf16.msra.mxu1 %v5017_v48  ;;  %v5098_v48 = vld [vmem:[#allocation8 + $0x30] ss:$8 sps:$4 sm:$0xff]  }
 0x385   : > { %3271 = vmatpush1.bf16.msra.mxu0 %v5020_v49  ;;  %3108 = vmatprep.subr.bf16.mxu1 %v5025_v54  ;;  %v5103_v49 = vld [vmem:[#allocation8 + $0x44] ss:$8 sps:$4 sm:$0xff]   ;;  %v5101_v54 = vld [vmem:[#allocation8 + $0x40] ss:$8 sps:$4 sm:$0xff]  }
 0x386   : > { %3272 = vmatprep.subr.bf16.mxu0 %v5028_v53  ;;  %v5106_v53 = vld [vmem:[#allocation8 + $0x54] ss:$8 sps:$4 sm:$0xff]  }
 0x388   : > { %3109 = vmatpush1.bf16.msra.mxu1 %v5023_v55  ;;  %v5104_v55 = vld [vmem:[#allocation8 + $0x50] ss:$8 sps:$4 sm:$0xff]  }
 0x389   : > { %3273 = vmatpush1.bf16.msra.mxu0 %v5026_v56  ;;  %3110 = vmatprep.subr.bf16.mxu1 %v5031_v57  ;;  %v5109_v56 = vld [vmem:[#allocation8 + $0x64] ss:$8 sps:$4 sm:$0xff]   ;;  %v5107_v57 = vld [vmem:[#allocation8 + $0x60] ss:$8 sps:$4 sm:$0xff]  }
 0x38a   : > { %3274 = vmatprep.subr.bf16.mxu0 %v5034_v58  ;;  %v5112_v58 = vld [vmem:[#allocation8 + $0x74] ss:$8 sps:$4 sm:$0xff]  }
 0x38c   : > { %3111 = vmatpush1.bf16.msra.mxu1 %v5029_v59  ;;  %v5110_v59 = vld [vmem:[#allocation8 + $0x70] ss:$8 sps:$4 sm:$0xff]  }
 0x38d   : > { %3275 = vmatpush1.bf16.msra.mxu0 %v5032_v60  ;;  %3112 = vmatprep.subr.bf16.mxu1 %v5037_v61  ;;  %v5115_v60 = vld [vmem:[#allocation8 + $0x84] ss:$8 sps:$4 sm:$0xff]   ;;  %v5113_v61 = vld [vmem:[#allocation8 + $0x80] ss:$8 sps:$4 sm:$0xff]  }
 0x38e   : > { %3276 = vmatprep.subr.bf16.mxu0 %v5040_v62  ;;  %v5118_v62 = vld [vmem:[#allocation8 + $0x94] ss:$8 sps:$4 sm:$0xff]  }
 0x390   : > { %3113 = vmatpush1.bf16.msra.mxu1 %v5035_v63  ;;  %v5116_v63 = vld [vmem:[#allocation8 + $0x90] ss:$8 sps:$4 sm:$0xff]  }
 0x391   : > { %3277 = vmatpush1.bf16.msra.mxu0 %v5038_v0  ;;  %3114 = vmatprep.subr.bf16.mxu1 %v5043_v2  ;;  %v5121_v0 = vld [vmem:[#allocation8 + $0xa4] ss:$8 sps:$4 sm:$0xff]   ;;  %v5119_v2 = vld [vmem:[#allocation8 + $0xa0] ss:$8 sps:$4 sm:$0xff]  }
 0x392   : > { %3278 = vmatprep.subr.bf16.mxu0 %v5046_v3  ;;  %v5124_v3 = vld [vmem:[#allocation8 + $0xb4] ss:$8 sps:$4 sm:$0xff]  }
 0x394   : > { %3115 = vmatpush1.bf16.msra.mxu1 %v5041_v4  ;;  %v5122_v4 = vld [vmem:[#allocation8 + $0xb0] ss:$8 sps:$4 sm:$0xff]  }
 0x395   : > { %3279 = vmatpush1.bf16.msra.mxu0 %v5044_v5  ;;  %3116 = vmatprep.subr.bf16.mxu1 %v5049_v6  ;;  %v5127_v5 = vld [vmem:[#allocation8 + $0xc4] ss:$8 sps:$4 sm:$0xff]   ;;  %v5125_v6 = vld [vmem:[#allocation8 + $0xc0] ss:$8 sps:$4 sm:$0xff]  }
 0x396   : > { %3280 = vmatprep.subr.bf16.mxu0 %v5052_v7  ;;  %v5130_v7 = vld [vmem:[#allocation8 + $0xd4] ss:$8 sps:$4 sm:$0xff]  }
 0x398   : > { %3117 = vmatpush1.bf16.msra.mxu1 %v5047_v8  ;;  %v5128_v8 = vld [vmem:[#allocation8 + $0xd0] ss:$8 sps:$4 sm:$0xff]  }
 0x399   : > { %3281 = vmatpush1.bf16.msra.mxu0 %v5050_v10  ;;  %3118 = vmatprep.subr.bf16.mxu1 %v5055_v14  ;;  %v5133_v10 = vld [vmem:[#allocation8 + $0xe4] ss:$8 sps:$4 sm:$0xff]   ;;  %v5131_v14 = vld [vmem:[#allocation8 + $0xe0] ss:$8 sps:$4 sm:$0xff]  }
 0x39a   : > { %3282 = vmatprep.subr.bf16.mxu0 %v5058_v51  ;;  %v5136_v51 = vld [vmem:[#allocation8 + $0xf4] ss:$8 sps:$4 sm:$0xff]  }
 0x39c   : > { %3119 = vmatpush1.bf16.msra.mxu1 %v5053_v15  ;;  %v5134_v15 = vld [vmem:[#allocation8 + $0xf0] ss:$8 sps:$4 sm:$0xff]  }
 0x39d   : > { %3283 = vmatpush1.bf16.msra.mxu0 %v5056_v17  ;;  %3120 = vmatprep.subr.bf16.mxu1 %v5061_v18  ;;  %v5185_v17 = vld [vmem:[#allocation9 + $0x40] sm:$0xff]  }
 0x39e   : > { %3284 = vmatprep.subr.bf16.mxu0 %v5064_v50  ;;  %v5186_v18 = vld [vmem:[#allocation9] sm:$0xff]   ;;  %v5187_v50 = vld [vmem:[#allocation9 + $0x48] sm:$0xff]  }
 0x3a0   : > { %3121 = vmatpush1.bf16.msra.mxu1 %v5059_v19  ;;  %v5188_v19 = vld [vmem:[#allocation9 + $0x8] sm:$0xff]  }
 0x3a1   : > { %3285 = vmatpush1.bf16.msra.mxu0 %v5062_v21  ;;  %3122 = vmatprep.subr.bf16.mxu1 %v5067_v22  ;;  %v5190_v21 = vld [vmem:[#allocation9 + $0x10] sm:$0xff]   ;;  %v5191_v22 = vld [vmem:[#allocation9 + $0x58] sm:$0xff]  }
 0x3a2   : > { %3286 = vmatprep.subr.bf16.mxu0 %v5070_v23  ;;  %v5192_v23 = vld [vmem:[#allocation9 + $0x18] sm:$0xff]  }
 0x3a4   : > { %3123 = vmatpush1.bf16.msra.mxu1 %v5065_v24  ;;  %v5193_v24 = vld [vmem:[#allocation9 + $0x60] sm:$0xff]  }
 0x3a5   : > { %3287 = vmatpush1.bf16.msra.mxu0 %v5068_v40  ;;  %3124 = vmatprep.subr.bf16.mxu1 %v5073_v26  ;;  %v5195_v40 = vld [vmem:[#allocation9 + $0x68] sm:$0xff]  }
 0x3a6   : > { %3288 = vmatprep.subr.bf16.mxu0 %v5076_v27  ;;  %v5196_v26 = vld [vmem:[#allocation9 + $0x28] sm:$0xff]   ;;  %v5767_v27 = vld [vmem:[%s5848_s8] sm:$0xf] }
 0x3a7   : > { %v2962_v29 = vrot.slane %v5767_v27, %v5687_v41 }
 0x3a8   : > { %3125 = vmatpush1.bf16.msra.mxu1 %v5071_v28  ;;  %v2958_v28 = vrot.slane %v5767_v27, %v5690_v42 }
 0x3a9   : > { %3289 = vmatpush1.bf16.msra.mxu0 %v5074_v47  ;;  %3126 = vmatprep.subr.bf16.mxu1 %v5079_v30  ;;  %v2970_v47 = vrot.slane %v5767_v27, %v5702_v52 }
 0x3aa   : > { %3290 = vmatprep.subr.bf16.mxu0 %v5082_v31 }
 0x3ac   : > { %3127 = vmatpush1.bf16.msra.mxu1 %v5077_v32 }
 0x3ad   : > { %3291 = vmatpush1.bf16.msra.mxu0 %v5080_v33  ;;  %3128 = vmatprep.subr.bf16.mxu1 %v5085_v11 }
 0x3ae   : > { %3292 = vmatprep.subr.bf16.mxu0 %v5088_v12 }
 0x3b0   : > { %3129 = vmatpush1.bf16.msra.mxu1 %v5083_v13 }
 0x3b1   : > { %3293 = vmatpush1.bf16.msra.mxu0 %v5086_v34  ;;  %3707 = vmatprep.subr.bf16.mxu1 %v5091_v36 }
 0x3b2   : > { %4517 = vmatprep.subr.bf16.mxu0 %v5185_v17  ;;  %v5181_v17 = vld [vmem:[#allocation8 + $0x1e4] ss:$8 sps:$4 sm:$0xff]  }
 0x3b3   : > { %3131 = vmatmul.mubr.bf16.vlgmr.msra.gmra.mrb[4].mxu1 %v1415_v38 }
 0x3b4   : > { %3295 = vmatmul.mubr.bf16.vlgmr.msra.gmra.mrb[16].mxu0 %v1415_v38  ;;  %3708 = vmatpush1.bf16.msra.mxu1 %v5089_v37 }
 0x3b5   : > { %3709 = vmatprep.subr.bf16.mxu1 %v5094_v43  ;;  %4518 = vmatpush3.bf16.msra.mxu0 %v5186_v18  ;;  %v5179_v18 = vld [vmem:[#allocation8 + $0x1e0] ss:$8 sps:$4 sm:$0xff]  }
 0x3b6   : > { %4519 = vmatprep.subr.bf16.mxu0 %v5187_v50 }
 0x3b8   : > { %3710 = vmatpush1.bf16.msra.mxu1 %v5092_v9 }
 0x3b9   : > { %3711 = vmatprep.subr.bf16.mxu1 %v5097_v44  ;;  %4520 = vmatpush3.bf16.msra.mxu0 %v5188_v19  ;;  %v5137_v44 = vld [vmem:[#allocation8 + $0x100] ss:$8 sps:$4 sm:$0xff]   ;;  %v5184_v19 = vld [vmem:[#allocation8 + $0x1f4] ss:$8 sps:$4 sm:$0xff]  }
 0x3ba   : > { %4521 = vmatprep.subr.bf16.mxu0 %v5189_v20  ;;  %v5182_v20 = vld [vmem:[#allocation8 + $0x1f0] ss:$8 sps:$4 sm:$0xff]  }
 0x3bc   : > { %3712 = vmatpush1.bf16.msra.mxu1 %v5095_v45 }
 0x3bd   : > { %3713 = vmatprep.subr.bf16.mxu1 %v5100_v39  ;;  %4522 = vmatpush3.bf16.msra.mxu0 %v5190_v21  ;;  %v5142_v39 = vld [vmem:[#allocation8 + $0x114] ss:$8 sps:$4 sm:$0xff]  }
 0x3be   : > { %4523 = vmatprep.subr.bf16.mxu0 %v5191_v22 }
 0x3c0   : > { %3714 = vmatpush1.bf16.msra.mxu1 %v5098_v48  ;;  %v5140_v48 = vld [vmem:[#allocation8 + $0x110] ss:$8 sps:$4 sm:$0xff]  }
 0x3c1   : > { %3715 = vmatprep.subr.bf16.mxu1 %v5103_v49  ;;  %4524 = vmatpush3.bf16.msra.mxu0 %v5192_v23  ;;  %v5145_v49 = vld [vmem:[#allocation8 + $0x124] ss:$8 sps:$4 sm:$0xff]   ;;  %v5197_v23 = vld [vmem:[#allocation9 + $0x70] sm:$0xff]  }
 0x3c2   : > { %4525 = vmatprep.subr.bf16.mxu0 %v5193_v24  ;;  %v5198_v24 = vld [vmem:[#allocation9 + $0x30] sm:$0xff]  }
 0x3c4   : > { %3716 = vmatpush1.bf16.msra.mxu1 %v5101_v54  ;;  %v5143_v54 = vld [vmem:[#allocation8 + $0x120] ss:$8 sps:$4 sm:$0xff]  }
 0x3c5   : > { %3717 = vmatprep.subr.bf16.mxu1 %v5106_v53  ;;  %4526 = vmatpush3.bf16.msra.mxu0 %v5194_v25  ;;  %v5148_v53 = vld [vmem:[#allocation8 + $0x134] ss:$8 sps:$4 sm:$0xff]  }
 0x3c6   : > { %4527 = vmatprep.subr.bf16.mxu0 %v5195_v40  ;;  %v5200_v25 = vld [vmem:[#allocation9 + $0x38] sm:$0xff]   ;;  %v3375_v40 = vld [vmem:[%s5850_s10] sm:$0x3] }
 0x3c8   : > { %3718 = vmatpush1.bf16.msra.mxu1 %v5104_v55  ;;  %v5146_v55 = vld [vmem:[#allocation8 + $0x130] ss:$8 sps:$4 sm:$0xff]  }
 0x3c9   : > { %3719 = vmatprep.subr.bf16.mxu1 %v5109_v56  ;;  %4528 = vmatpush3.bf16.msra.mxu0 %v5196_v26  ;;  %v5151_v56 = vld [vmem:[#allocation8 + $0x144] ss:$8 sps:$4 sm:$0xff]   ;;  %v3700_v26 = vrot.slane %v3375_v40, %v5690_v42 }
 0x3ca   : > { %4529 = vmatprep.subr.bf16.mxu0 %v5197_v23 }
 0x3cc   : > { %3720 = vmatpush1.bf16.msra.mxu1 %v5107_v57  ;;  %v5149_v57 = vld [vmem:[#allocation8 + $0x140] ss:$8 sps:$4 sm:$0xff]  }
 0x3cd   : > { %3721 = vmatprep.subr.bf16.mxu1 %v5112_v58  ;;  %v5154_v58 = vld [vmem:[#allocation8 + $0x154] ss:$8 sps:$4 sm:$0xff]   ;;  %4530 = vmatpush3.bf16.msra.mxu0 %v5198_v24 }
 0x3d0   : > { %3722 = vmatpush1.bf16.msra.mxu1 %v5110_v59  ;;  %v5152_v59 = vld [vmem:[#allocation8 + $0x150] ss:$8 sps:$4 sm:$0xff]  }
 0x3d1   : > { %3723 = vmatprep.subr.bf16.mxu1 %v5115_v60  ;;  %v5157_v60 = vld [vmem:[#allocation8 + $0x164] ss:$8 sps:$4 sm:$0xff]  }
 0x3d4   : > { %3724 = vmatpush1.bf16.msra.mxu1 %v5113_v61  ;;  %v5155_v61 = vld [vmem:[#allocation8 + $0x160] ss:$8 sps:$4 sm:$0xff]  }
 0x3d5   : > { %3725 = vmatprep.subr.bf16.mxu1 %v5118_v62  ;;  %v5160_v62 = vld [vmem:[#allocation8 + $0x174] ss:$8 sps:$4 sm:$0xff]  }
 0x3d8   : > { %3726 = vmatpush1.bf16.msra.mxu1 %v5116_v63  ;;  %v5158_v63 = vld [vmem:[#allocation8 + $0x170] ss:$8 sps:$4 sm:$0xff]  }
 0x3d9   : > { %3727 = vmatprep.subr.bf16.mxu1 %v5121_v0  ;;  %v5163_v0 = vld [vmem:[#allocation8 + $0x184] ss:$8 sps:$4 sm:$0xff]  }
 0x3dc   : > { %3728 = vmatpush1.bf16.msra.mxu1 %v5119_v2  ;;  %v5161_v2 = vld [vmem:[#allocation8 + $0x180] ss:$8 sps:$4 sm:$0xff]  }
 0x3dd   : > { %3729 = vmatprep.subr.bf16.mxu1 %v5124_v3  ;;  %v5166_v3 = vld [vmem:[#allocation8 + $0x194] ss:$8 sps:$4 sm:$0xff]  }
 0x3e0   : > { %3730 = vmatpush1.bf16.msra.mxu1 %v5122_v4  ;;  %v5164_v4 = vld [vmem:[#allocation8 + $0x190] ss:$8 sps:$4 sm:$0xff]  }
 0x3e1   : > { %3731 = vmatprep.subr.bf16.mxu1 %v5127_v5  ;;  %v5169_v5 = vld [vmem:[#allocation8 + $0x1a4] ss:$8 sps:$4 sm:$0xff]  }
 0x3e4   : > { %3732 = vmatpush1.bf16.msra.mxu1 %v5125_v6  ;;  %v5167_v6 = vld [vmem:[#allocation8 + $0x1a0] ss:$8 sps:$4 sm:$0xff]  }
 0x3e5   : > { %3733 = vmatprep.subr.bf16.mxu1 %v5130_v7  ;;  %v5172_v7 = vld [vmem:[#allocation8 + $0x1b4] ss:$8 sps:$4 sm:$0xff]  }
 0x3e8   : > { %3734 = vmatpush1.bf16.msra.mxu1 %v5128_v8  ;;  %v5170_v8 = vld [vmem:[#allocation8 + $0x1b0] ss:$8 sps:$4 sm:$0xff]  }
 0x3e9   : > { %3735 = vmatprep.subr.bf16.mxu1 %v5133_v10  ;;  %v5175_v10 = vld [vmem:[#allocation8 + $0x1c4] ss:$8 sps:$4 sm:$0xff]  }
 0x3ec   : > { %3736 = vmatpush1.bf16.msra.mxu1 %v5131_v14  ;;  %v5173_v14 = vld [vmem:[#allocation8 + $0x1c0] ss:$8 sps:$4 sm:$0xff]  }
 0x3ed   : > { %3737 = vmatprep.subr.bf16.mxu1 %v5136_v51  ;;  %v5178_v51 = vld [vmem:[#allocation8 + $0x1d4] ss:$8 sps:$4 sm:$0xff]  }
 0x3f0   : > { %3738 = vmatpush1.bf16.msra.mxu1 %v5134_v15  ;;  %v5176_v15 = vld [vmem:[#allocation8 + $0x1d0] ss:$8 sps:$4 sm:$0xff]  }
 0x3f1   : > { %3748 = vmatprep.subr.bf16.mxu1 %v5139_v16  ;;  %v2966_v16 = vrot.slane %v5767_v27, %v5696_v46  ;;  %v5199_v46 = vld [vmem:[#allocation9 + $0x78] sm:$0xff]   ;;  %v3704_v27 = vrot.slane %v3375_v40, %v5687_v41  ;;  %v3825_v41 = vld [vmem:[%s5888_s29] sm:$0x1] }
 0x3f2   : > { %4531 = vmatprep.subr.bf16.mxu0 %v5199_v46 }
 0x3f3   : > { %4532 = vmatpush3.bf16.msra.mxu0 %v5200_v25 }
 0x486   : > { %v3132_v30 = vpop.f32.mrb[4].mxu1 }
 0x487   : > { %v4551_v31 = vadd.f32 %v3132_v30, %v2958_v28  ;;  %v5775_v32 = vpop.f32.mrb[16].mxu0  ;;  %v3134_v1 = vpop.f32.mrb[5].mxu1 }
 0x488   : > { %v4552_v33 = vadd.f32 %v3134_v1, %v2962_v29  ;;  %v3298_v11 = vpop.f32.mrb[17].mxu0  ;;  %v3136_v12 = vpop.f32.mrb[6].mxu1  ;;  %v4553_v50 = vadd.f32 %v5775_v32, %v2966_v16 }
 0x489   : > { %v3303_v13 = vmax.f32 %v4551_v31, 0.0  ;;  %v4554_v34 = vadd.f32 %v3298_v11, %v2970_v47  ;;  %v3300_v35 = vpop.f32.mrb[18].mxu0  ;;  %v3137_v36 = vpop.f32.mrb[7].mxu1 }
 0x48a   : > { %v3304_v37 = vmax.f32 %v4552_v33, 0.0  ;;  %v3301_v38 = vpop.f32.mrb[19].mxu0  ;;  %v3305_v21 = vmax.f32 %v4553_v50, 0.0 }
 0x48b   : > { %v3306_v43 = vmax.f32 %v4554_v34, 0.0  ;;  %v3307_v45 = vpack.c.bf16 %v3303_v13, %v3303_v13 }
 0x48c   : > { %v3308_v9 = vpack.c.bf16 %v3304_v37, %v3304_v37  ;;  %v3309_v22 = vpack.c.bf16 %v3305_v21, %v3305_v21 }
 0x48d   : > { %v3310_v52 = vpack.c.bf16 %v3306_v43, %v3306_v43 }
 0x48e   : > { %3739 = vmatprep.mubr.bf16.mxu1 %v3308_v9 }
 0x48f   : > { %3740 = vmatmul.mubr.bf16.vlgmr.msra.gmra.mrb[8].mxu1 %v3307_v45 }
 0x490   : > { %3749 = vmatpush1.bf16.msra.mxu1 %v5137_v44  ;;  %3780 = vmatprep.mubr.bf16.mxu1 %v3310_v52 }
 0x491   : > { %3750 = vmatprep.subr.bf16.mxu1 %v5142_v39 }
 0x494   : > { %3751 = vmatpush1.bf16.msra.mxu1 %v5140_v48 }
 0x495   : > { %3752 = vmatprep.subr.bf16.mxu1 %v5145_v49 }
 0x498   : > { %3753 = vmatpush1.bf16.msra.mxu1 %v5143_v54 }
 0x499   : > { %3754 = vmatprep.subr.bf16.mxu1 %v5148_v53 }
 0x49c   : > { %3755 = vmatpush1.bf16.msra.mxu1 %v5146_v55 }
 0x49d   : > { %3756 = vmatprep.subr.bf16.mxu1 %v5151_v56 }
 0x4a0   : > { %3757 = vmatpush1.bf16.msra.mxu1 %v5149_v57 }
 0x4a1   : > { %3758 = vmatprep.subr.bf16.mxu1 %v5154_v58 }
 0x4a4   : > { %3759 = vmatpush1.bf16.msra.mxu1 %v5152_v59 }
 0x4a5   : > { %3760 = vmatprep.subr.bf16.mxu1 %v5157_v60 }
 0x4a8   : > { %3761 = vmatpush1.bf16.msra.mxu1 %v5155_v61 }
 0x4a9   : > { %3762 = vmatprep.subr.bf16.mxu1 %v5160_v62 }
 0x4ac   : > { %3763 = vmatpush1.bf16.msra.mxu1 %v5158_v63 }
 0x4ad   : > { %3764 = vmatprep.subr.bf16.mxu1 %v5163_v0 }
 0x4b0   : > { %3765 = vmatpush1.bf16.msra.mxu1 %v5161_v2 }
 0x4b1   : > { %3766 = vmatprep.subr.bf16.mxu1 %v5166_v3 }
 0x4b4   : > { %3767 = vmatpush1.bf16.msra.mxu1 %v5164_v4 }
 0x4b5   : > { %3768 = vmatprep.subr.bf16.mxu1 %v5169_v5 }
 0x4b8   : > { %3769 = vmatpush1.bf16.msra.mxu1 %v5167_v6 }
 0x4b9   : > { %3770 = vmatprep.subr.bf16.mxu1 %v5172_v7 }
 0x4bc   : > { %3771 = vmatpush1.bf16.msra.mxu1 %v5170_v8 }
 0x4bd   : > { %3772 = vmatprep.subr.bf16.mxu1 %v5175_v10 }
 0x4c0   : > { %3773 = vmatpush1.bf16.msra.mxu1 %v5173_v14 }
 0x4c1   : > { %3774 = vmatprep.subr.bf16.mxu1 %v5178_v51 }
 0x4c4   : > { %3775 = vmatpush1.bf16.msra.mxu1 %v5176_v15 }
 0x4c5   : > { %3776 = vmatprep.subr.bf16.mxu1 %v5181_v17 }
 0x4c8   : > { %3777 = vmatpush1.bf16.msra.mxu1 %v5179_v18 }
 0x4c9   : > { %3778 = vmatprep.subr.bf16.mxu1 %v5184_v19 }
 0x4cc   : > { %3779 = vmatpush1.bf16.msra.mxu1 %v5182_v20 }
 0x4cf   : > { %3781 = vmatmul.mubr.bf16.vlgmr.msra.gmra.mrb[8].mxu1 %v3309_v22 }
 0x5a2   : > { %v3782_v28 = vpop.f32.mrb[8].mxu1 }
 0x5a3   : > { %v4555_v29 = vadd.f32 %v3782_v28, %v3700_v26  ;;  %v3784_v47 = vpop.f32.mrb[9].mxu1 }
 0x5a4   : > { %v4556_v30 = vadd.f32 %v3784_v47, %v3704_v27  ;;  %v3786_v31 = vpop.f32.mrb[10].mxu1 }
 0x5a5   : > { %v3789_v32 = vmax.f32 %v4555_v29, 0.0  ;;  %v3787_v1 = vpop.f32.mrb[11].mxu1 }
 0x5a6   : > { %v3790_v33 = vmax.f32 %v4556_v30, 0.0 }
 0x5a7   : > { %v3791_v12 = vpack.c.bf16 %v3789_v32, %v3789_v32 }
 0x5a8   : > { %v3792_v11 = vpack.c.bf16 %v3790_v33, %v3790_v33 }
 0x5aa   : > { %3954 = vmatprep.mubr.bf16.mxu0 %v3792_v11 }
 0x5ab   : > { %3955 = vmatmul.mubr.bf16.vlgmr.msra.gmra.mrb[20].mxu0 %v3791_v12 }
 0x67e   : > { %v4533_v13 = vpop.f32.mrb[20].mxu0 }
 0x67f   : > { %v4534_v42 = vpop.f32.mrb[21].mxu0 }
 0x680   : > { %v4535_v34 = vadd.f32 %v4534_v42, %v4533_v13  ;;  %v4536_v35 = vpop.f32.mrb[22].mxu0 }
 0x681   : > { %v4537_v36 = vpop.f32.mrb[23].mxu0 }
 0x682   : > { %v3957_v37 = vadd.f32 %v4535_v34, %v3825_v41 }
 0x684   : > { %3962 = vst [vmem:[%s514_s20] sm:$0x1] %v3957_v37 }
 0x685   : > { %5326 = shalt.err (!%p5323_p6)
}
 0x686   : > { %s5327_s23 = scalar_lea.hbm %s5793_s22, 16  ;;  %s5331_s17 = scalar_lea.hbm %s5890_s12, 32 }
 0x687   : > { %p5328_p7 = scmp.ne.s32.totalorder %s5793_s22, %s5327_s23  ;;  %p5332_p4 = scmp.lt.u32.totalorder %s5793_s22, %s5890_s12 }
 0x688   : > { %p5333_p8 = scmp.lt.u32.totalorder %s5331_s17, %s5327_s23  ;;  %p5335_p1 = scmp.lt.u32.totalorder %s5327_s23, %s5793_s22 }
 0x689   : > { %p5329_p9 = pnand %p5328_p7, %p5891_p10 }
 0x68a   : > { %p5334_p13 = por %p5333_p8, %p5332_p4 }
 0x68b   : > { %p5330_p12 = pneg %p5329_p9 }
 0x68c   : > { %p5336_p11 = por %p5335_p1, %p5334_p13 }
 0x68e   : > { %p5337_p0 = pnand %p5336_p11, %p5330_p12 }
 0x690   : > { %5340 = shalt.err (!%p5337_p0)
}
 0x691   : > { %4601 = dma.vmem_to_hbm [thread:$0]  (%p5891_p10), %s5795_s13, 16, %s5793_s22, %s3964_s19  }
 0x692 PF: > { %s5892_s16 = sld [smem:[#allocation19_spill]]  ;;  %s5893_s20 = sld [smem:[#allocation16_spill]] }
 0x693   : > { %s5894_s18 = sld [smem:[#allocation22_spill]] }
 0x698   : > { %p4628_p2 = scmp.ge.s32.totalorder %s5892_s16, 2  ;;  %s3988_s7 = sand.u32 1, %s5893_s20  }
 0x699   : > { %p5895_p3 = scmp.ne.s32.totalorder %s5894_s18, 0  ;;  %s3989_s24 = scalar_lea.sflag [#allocation5], %s3988_s7 }
 0x69b   : > { %p4617_p5 = pnand %p4628_p2, %p5895_p3 }
 0x69d   : > { %5378 = dma.done.wait (!%p4617_p5), %s3989_s24, 16  }
 0x69e   : > { %5380 = vsyncadd (!%p4617_p5), %s3989_s24, 4294967280  ;;  %s29_s30 = sadd.s32 1, %s5892_s16   ;;  %s5896_s28 = sld [smem:[#allocation17_spill]] }
 0x69f   : > { %p26_p6 = scmp.ge.s32.totalorder %s29_s30, 4   ;;  %s5897_s27 = sld [smem:[#allocation23_spill]] }
 0x6a0   : > { %s5898_s15 = sld [smem:[#allocation18_spill]]  ;;  %s5899_s29 = sld [smem:[#allocation20_spill]] }
 0x6a1   : > { %s5900_s25 = smov %s5387_s26  ;;  %28 = sbr.rel (!%p26_p6) target bundleno = 11 (0xb), region = 132 }
 0x6a4   : > { %s5901_s26 = smov %s5896_s28 }
 0x6a6   : > { %s5902_s28 = smov %s5898_s15 }
 0x6a8   :  { %3993 = vsyncpa [#allocation4], 1 }
 0x6a9   :  { %3995 = vsyncpa [#allocation4 + $0x1], 1 }
 0x6aa   :  { %3996 = vsyncpa [#allocation7], 1 }
 0x6ab   :  { %3997 = vsyncpa [#allocation10], 1 }
 0x6ac   :  { %3998 = vsyncpa [#allocation5], 1 }
 0x6ad   :  { %4000 = vsyncpa [#allocation5 + $0x1], 1 }

</bundles_post_ra>
